<compile_context>
chip_gen: v5e
topology: v5e:2x2
jax: 0.10.0
libtpu: 0.0.40
codegen_flags: <defaults>
</compile_context>

<pallas_src>
import functools

import numpy as np
import jax
import jax.numpy as jnp
from jax.experimental import pallas as pl
from jax.experimental.pallas import tpu as pltpu

EPS = 1e-5


def _resnet_block_kernel(x_ref, gsel_ref,
                         w1_ref, g1_ref, be1_ref,
                         w2_ref, g2_ref, be2_ref,
                         w3_ref, g3_ref, be3_ref,
                         out_ref,
                         pad_in, pad_mid,
                         *, N, H, W, Cin, Cout):
    # Layouts (lanes pack (x, channel)):
    #   x_ref    : (N*H, W*Cin)            f32   lane-dense input slab
    #   gsel_ref : (W*Cout, W*Cout)        f32   channel-selector (j%Cout==k%Cout)
    #   w*_ref   : (3, (W+2)*C_in, W*Cout) bf16  banded per-ky conv weights
    #   g*/be*   : (1, W*Cout)             f32   lane-tiled BN gamma / beta
    #   out_ref  : (N*H, W*Cout)                 lane-dense output slab
    #   pad_in   : (N, H+2, (W+2)*Cin)     f32   padded activation slab (conv1)
    #   pad_mid  : (N, H+2, (W+2)*Cout)    f32   padded activation slab (conv2/3)

    # Zero each padded slab exactly once; the interiors are fully overwritten
    # before every conv, so the 1-pixel zero border survives pad_mid's reuse.
    pad_in[...] = jnp.zeros_like(pad_in)
    pad_mid[...] = jnp.zeros_like(pad_mid)

    gsel = gsel_ref[...]                      # hoisted: used by all 3 BN stages
    inv_cnt = 1.0 / float(N * H * W)

    def conv3x3(pad_ref, w_ref):
        # One MXU matmul per kernel row ky; the kx taps and the width padding
        # are folded into the banded weight, so K=(W+2)*C and the result is
        # already the lane-dense (N*H, W*Cout) slab.  bf16 operands, f32 acc.
        taps = []
        for ky in range(3):
            rows = pad_ref[:, ky:ky + H, :].reshape(N * H, -1)
            taps.append(jnp.dot(rows.astype(jnp.bfloat16), w_ref[ky],
                                preferred_element_type=jnp.float32))
        return taps[0] + taps[1] + taps[2]

    def bn_relu(y, gl_ref, bel_ref):
        # Training-mode BatchNorm2d (biased batch variance) folded into a
        # single per-lane scale/shift FMA + ReLU.  Channel c lives at lanes
        # {x*Cout + c}; the selector matmul reduces over x and broadcasts the
        # per-channel stats back to every lane in one shot.
        s1 = jnp.sum(y, axis=0, keepdims=True)            # (1, W*Cout)
        s2 = jnp.sum(y * y, axis=0, keepdims=True)        # (1, W*Cout)
        stats = jnp.concatenate([s1, s2], axis=0)         # (2, W*Cout)
        stats = jnp.dot(stats, gsel,
                        preferred_element_type=jnp.float32) * inv_cnt
        mean = stats[0:1, :]
        var = stats[1:2, :] - mean * mean
        scale = gl_ref[...] * jax.lax.rsqrt(var + EPS)    # (1, W*Cout)
        shift = bel_ref[...] - mean * scale
        return jnp.maximum(y * scale + shift, 0.0)

    # NOTE: conv biases are intentionally not applied — training-mode BN's mean
    # subtraction cancels any per-channel constant added before it exactly.

    # layer 1
    pad_in[:, 1:H + 1, Cin:(W + 1) * Cin] = x_ref[...].reshape(N, H, W * Cin)
    h = bn_relu(conv3x3(pad_in, w1_ref), g1_ref, be1_ref)

    # layer 2
    pad_mid[:, 1:H + 1, Cout:(W + 1) * Cout] = h.reshape(N, H, W * Cout)
    h = bn_relu(conv3x3(pad_mid, w2_ref), g2_ref, be2_ref)

    # layer 3
    pad_mid[:, 1:H + 1, Cout:(W + 1) * Cout] = h.reshape(N, H, W * Cout)
    h = bn_relu(conv3x3(pad_mid, w3_ref), g3_ref, be3_ref)

    # Lane-dense writeback: last dim = W*Cout (= 128 here) -> unmasked stores.
    out_ref[...] = h.astype(out_ref.dtype)


def _pack_banded_weight(w_oihw, W):
    """(Cout, Cin, 3, 3) -> (3, (W+2)*Cin, W*Cout) bf16 banded matrices.

    For kernel row ky:  B[ky, (x+kx)*Cin + ci, x*Cout + co] = w[co, ci, ky, kx]
    so a 3x3 conv over the 2-D padded activation slab becomes three lane-dense
    MXU matmuls.  (Toy-size trick: the band grows with W; at large spatial
    sizes this would be replaced by a (9*Cin, Cout) im2col weight + tiling.)
    """
    w = np.asarray(w_oihw).transpose(2, 3, 1, 0)        # (ky, kx, Cin, Cout)
    Cin, Cout = w.shape[2], w.shape[3]
    B = np.zeros((3, (W + 2) * Cin, W * Cout), np.float32)
    for ky in range(3):
        for kx in range(3):
            for x in range(W):
                B[ky, (x + kx) * Cin:(x + kx + 1) * Cin,
                  x * Cout:(x + 1) * Cout] = w[ky, kx]
    return jnp.asarray(B, dtype=jnp.bfloat16)


def resnet_basic_block_nhwc(x_nhwc, p):
    """x_nhwc: (N, H, W, Cin) f32; p: PyTorch-layout params (w OIHW, b, g, be)."""
    N, H, W, Cin = x_nhwc.shape
    Cout = p["w1"].shape[0]

    # Host-side, one-time packing into kernel layouts.
    wb = [_pack_banded_weight(p[f"w{i}"], W) for i in (1, 2, 3)]
    gl = [jnp.tile(jnp.asarray(p[f"g{i}"], jnp.float32).reshape(1, Cout), (1, W))
          for i in (1, 2, 3)]
    bel = [jnp.tile(jnp.asarray(p[f"be{i}"], jnp.float32).reshape(1, Cout), (1, W))
           for i in (1, 2, 3)]
    lane = np.arange(W * Cout)
    gsel = jnp.asarray((lane[:, None] % Cout == lane[None, :] % Cout)
                       .astype(np.float32))
    # p["b1..3"] (conv biases) are deliberately not passed: BN cancels them.

    x2d = x_nhwc.reshape(N * H, W * Cin)                # lane-dense input slab

    kernel = functools.partial(_resnet_block_kernel,
                               N=N, H=H, W=W, Cin=Cin, Cout=Cout)

    def full(a):
        return pl.BlockSpec(a.shape, lambda i, nd=a.ndim: (0,) * nd)

    args = (x2d, gsel,
            wb[0], gl[0], bel[0],
            wb[1], gl[1], bel[1],
            wb[2], gl[2], bel[2])

    y2d = pl.pallas_call(
        kernel,
        out_shape=jax.ShapeDtypeStruct((N * H, W * Cout), x_nhwc.dtype),
        grid=(1,),
        in_specs=[full(a) for a in args],
        out_specs=pl.BlockSpec((N * H, W * Cout), lambda i: (0, 0)),
        scratch_shapes=[
            pltpu.VMEM((N, H + 2, (W + 2) * Cin), jnp.float32),
            pltpu.VMEM((N, H + 2, (W + 2) * Cout), jnp.float32),
        ],
        compiler_params=pltpu.CompilerParams(
            dimension_semantics=("arbitrary",),
            vmem_limit_bytes=32 * 1024 * 1024,
        ),
    )(*args)

    # Lane-dense slab -> NHWC (pure layout plumbing, done by XLA outside).
    return y2d.reshape(N, H, W, Cout)


def make_params(key, in_channels, out_channels):
    ks = jax.random.split(key, 12)
    p = {}
    shapes = [(out_channels, in_channels, 3, 3),
              (out_channels, out_channels, 3, 3),
              (out_channels, out_channels, 3, 3)]
    for i, (wshape, k4) in enumerate(zip(shapes, range(0, 12, 4)), start=1):
        p[f"w{i}"] = 0.1 * jax.random.normal(ks[k4 + 0], wshape, jnp.float32)
        p[f"b{i}"] = 0.05 * jax.random.normal(ks[k4 + 1], (wshape[0],), jnp.float32)
        p[f"g{i}"] = 1.0 + 0.1 * jax.random.normal(ks[k4 + 2], (wshape[0],), jnp.float32)
        p[f"be{i}"] = 0.05 * jax.random.normal(ks[k4 + 3], (wshape[0],), jnp.float32)
    return p


def ref_block_nchw(x, p):
    # Pure-JAX reference mirroring the PyTorch forward (training-mode BN,
    # conv biases included — they are a mathematical no-op under training BN).
    def conv(x, w, b):
        y = jax.lax.conv_general_dilated(
            x, w, window_strides=(1, 1), padding=((1, 1), (1, 1)),
            dimension_numbers=("NCHW", "OIHW", "NCHW"),
            precision=jax.lax.Precision.HIGHEST)
        return y + b[None, :, None, None]

    def bn(x, g, be):
        mean = jnp.mean(x, axis=(0, 2, 3), keepdims=True)
        var = jnp.mean((x - mean) ** 2, axis=(0, 2, 3), keepdims=True)
        xn = (x - mean) * jax.lax.rsqrt(var + EPS)
        return xn * g[None, :, None, None] + be[None, :, None, None]

    h = jax.nn.relu(bn(conv(x, p["w1"], p["b1"]), p["g1"], p["be1"]))
    h = jax.nn.relu(bn(conv(h, p["w2"], p["b2"]), p["g2"], p["be2"]))
    h = jax.nn.relu(bn(conv(h, p["w3"], p["b3"]), p["g3"], p["be3"]))
    return h


if __name__ == "__main__":
    in_channels, out_channels = 4, 8
    N, H, W = 2, 16, 16

    key = jax.random.PRNGKey(0)
    kx, kp = jax.random.split(key)
    x_nchw = jax.random.normal(kx, (N, in_channels, H, W), jnp.float32)
    p = make_params(kp, in_channels, out_channels)

    # NCHW -> NHWC for the kernel wrapper.
    x_nhwc = jnp.transpose(x_nchw, (0, 2, 3, 1))
    y_nhwc = resnet_basic_block_nhwc(x_nhwc, p)
    y_nhwc = jax.block_until_ready(y_nhwc)
    y_nchw = jnp.transpose(y_nhwc, (0, 3, 1, 2))

    y_ref = ref_block_nchw(x_nchw, p)
    assert y_nchw.shape == (N, out_channels, H, W)
    err = float(jnp.max(jnp.abs(y_nchw - y_ref)))
    # bf16 MXU operands (with f32 accumulation and f32 BN statistics) across
    # three stacked conv+BN+ReLU layers: use a bf16-appropriate tolerance.
    assert err < 5e-2, f"max abs err {err}"

    print("KERNEL_OK")
</pallas_src>

<mosaic_0001>
module attributes {stable_mosaic.version = 11 : i64} {
  func.func @_resnet_block_kernel(%arg0: i32, %arg1: memref<32x64xf32, #tpu.memory_space<vmem>>, %arg2: memref<128x128xf32, #tpu.memory_space<vmem>>, %arg3: memref<3x72x128xbf16, #tpu.memory_space<vmem>>, %arg4: memref<1x128xf32, #tpu.memory_space<vmem>>, %arg5: memref<1x128xf32, #tpu.memory_space<vmem>>, %arg6: memref<3x144x128xbf16, #tpu.memory_space<vmem>>, %arg7: memref<1x128xf32, #tpu.memory_space<vmem>>, %arg8: memref<1x128xf32, #tpu.memory_space<vmem>>, %arg9: memref<3x144x128xbf16, #tpu.memory_space<vmem>>, %arg10: memref<1x128xf32, #tpu.memory_space<vmem>>, %arg11: memref<1x128xf32, #tpu.memory_space<vmem>>, %arg12: memref<32x128xf32, #tpu.memory_space<vmem>>, %arg13: memref<2x18x72xf32, #tpu.memory_space<vmem>>, %arg14: memref<2x18x144xf32, #tpu.memory_space<vmem>>) attributes {dimension_semantics = [#tpu.dimension_semantics<arbitrary>], iteration_bounds = array<i64: 1>, scalar_prefetch = 0 : i64, scratch_operands = 2 : i64, tpu.core_type = #tpu.core_type<tc>, window_params = [{pipeline_mode = #tpu.pipeline_mode<synchronous>, transform_indices = @transform_0, window_bounds = array<i64: 32, 64>}, {pipeline_mode = #tpu.pipeline_mode<synchronous>, transform_indices = @transform_1, window_bounds = array<i64: 128, 128>}, {pipeline_mode = #tpu.pipeline_mode<synchronous>, transform_indices = @transform_2, window_bounds = array<i64: 3, 72, 128>}, {pipeline_mode = #tpu.pipeline_mode<synchronous>, transform_indices = @transform_3, window_bounds = array<i64: 1, 128>}, {pipeline_mode = #tpu.pipeline_mode<synchronous>, transform_indices = @transform_4, window_bounds = array<i64: 1, 128>}, {pipeline_mode = #tpu.pipeline_mode<synchronous>, transform_indices = @transform_5, window_bounds = array<i64: 3, 144, 128>}, {pipeline_mode = #tpu.pipeline_mode<synchronous>, transform_indices = @transform_6, window_bounds = array<i64: 1, 128>}, {pipeline_mode = #tpu.pipeline_mode<synchronous>, transform_indices = @transform_7, window_bounds = array<i64: 1, 128>}, {pipeline_mode = #tpu.pipeline_mode<synchronous>, transform_indices = @transform_8, window_bounds = array<i64: 3, 144, 128>}, {pipeline_mode = #tpu.pipeline_mode<synchronous>, transform_indices = @transform_9, window_bounds = array<i64: 1, 128>}, {pipeline_mode = #tpu.pipeline_mode<synchronous>, transform_indices = @transform_10, window_bounds = array<i64: 1, 128>}, {pipeline_mode = #tpu.pipeline_mode<synchronous>, transform_indices = @transform_11, window_bounds = array<i64: 32, 128>}]} {
    %cst = arith.constant 0.000000e+00 : f32
    %0 = vector.broadcast %cst : f32 to vector<2x18x72xf32>
    %c0 = arith.constant 0 : index
    %c0_0 = arith.constant 0 : index
    %c0_1 = arith.constant 0 : index
    %1 = vector.load %arg13[%c0, %c0_0, %c0_1] : memref<2x18x72xf32, #tpu.memory_space<vmem>>, vector<2x18x72xf32>
    tpu.vector_store %arg13[%c0, %c0_0, %c0_1], %0 {strides = array<i32>} : memref<2x18x72xf32, #tpu.memory_space<vmem>>, vector<2x18x72xf32>,
    %cst_2 = arith.constant 0.000000e+00 : f32
    %2 = vector.broadcast %cst_2 : f32 to vector<2x18x144xf32>
    %c0_3 = arith.constant 0 : index
    %c0_4 = arith.constant 0 : index
    %c0_5 = arith.constant 0 : index
    %3 = vector.load %arg14[%c0_3, %c0_4, %c0_5] : memref<2x18x144xf32, #tpu.memory_space<vmem>>, vector<2x18x144xf32>
    tpu.vector_store %arg14[%c0_3, %c0_4, %c0_5], %2 {strides = array<i32>} : memref<2x18x144xf32, #tpu.memory_space<vmem>>, vector<2x18x144xf32>,
    %c0_6 = arith.constant 0 : index
    %c0_7 = arith.constant 0 : index
    %4 = vector.load %arg2[%c0_6, %c0_7] : memref<128x128xf32, #tpu.memory_space<vmem>>, vector<128x128xf32>
    %c0_8 = arith.constant 0 : index
    %c0_9 = arith.constant 0 : index
    %5 = vector.load %arg1[%c0_8, %c0_9] : memref<32x64xf32, #tpu.memory_space<vmem>>, vector<32x64xf32>
    %6 = vector.shape_cast %5 : vector<32x64xf32> to vector<2x16x64xf32>
    %c0_10 = arith.constant 0 : index
    %c1 = arith.constant 1 : index
    %c4 = arith.constant 4 : index
    %7 = vector.load %arg13[%c0_10, %c1, %c4] : memref<2x18x72xf32, #tpu.memory_space<vmem>>, vector<2x16x64xf32>
    tpu.vector_store %arg13[%c0_10, %c1, %c4], %6 {strides = array<i32>} : memref<2x18x72xf32, #tpu.memory_space<vmem>>, vector<2x16x64xf32>,
    %c0_11 = arith.constant 0 : index
    %c0_12 = arith.constant 0 : index
    %c0_13 = arith.constant 0 : index
    %8 = vector.load %arg13[%c0_11, %c0_12, %c0_13] : memref<2x18x72xf32, #tpu.memory_space<vmem>>, vector<2x16x72xf32>
    %9 = vector.shape_cast %8 : vector<2x16x72xf32> to vector<32x72xf32>
    %10 = arith.truncf %9 : vector<32x72xf32> to vector<32x72xbf16>
    %c0_14 = arith.constant 0 : index
    %c0_15 = arith.constant 0 : index
    %c0_16 = arith.constant 0 : index
    %11 = vector.load %arg3[%c0_14, %c0_15, %c0_16] : memref<3x72x128xbf16, #tpu.memory_space<vmem>>, vector<1x72x128xbf16>
    %12 = vector.shape_cast %11 : vector<1x72x128xbf16> to vector<72x128xbf16>
    %cst_17 = arith.constant dense<0.000000e+00> : vector<32x128xf32>
    %13 = tpu.matmul %10, %12, %cst_17 {dimension_numbers = #tpu.dot_dimension_numbers<[1], [0], [0], [1], [0, 0, 1, 1], [], []>} : vector<32x72xbf16>, vector<72x128xbf16>, vector<32x128xf32> -> vector<32x128xf32>
    %c0_18 = arith.constant 0 : index
    %c1_19 = arith.constant 1 : index
    %c0_20 = arith.constant 0 : index
    %14 = vector.load %arg13[%c0_18, %c1_19, %c0_20] : memref<2x18x72xf32, #tpu.memory_space<vmem>>, vector<2x16x72xf32>
    %15 = vector.shape_cast %14 : vector<2x16x72xf32> to vector<32x72xf32>
    %16 = arith.truncf %15 : vector<32x72xf32> to vector<32x72xbf16>
    %c1_21 = arith.constant 1 : index
    %c0_22 = arith.constant 0 : index
    %c0_23 = arith.constant 0 : index
    %17 = vector.load %arg3[%c1_21, %c0_22, %c0_23] : memref<3x72x128xbf16, #tpu.memory_space<vmem>>, vector<1x72x128xbf16>
    %18 = vector.shape_cast %17 : vector<1x72x128xbf16> to vector<72x128xbf16>
    %cst_24 = arith.constant dense<0.000000e+00> : vector<32x128xf32>
    %19 = tpu.matmul %16, %18, %cst_24 {dimension_numbers = #tpu.dot_dimension_numbers<[1], [0], [0], [1], [0, 0, 1, 1], [], []>} : vector<32x72xbf16>, vector<72x128xbf16>, vector<32x128xf32> -> vector<32x128xf32>
    %c0_25 = arith.constant 0 : index
    %c2 = arith.constant 2 : index
    %c0_26 = arith.constant 0 : index
    %20 = vector.load %arg13[%c0_25, %c2, %c0_26] : memref<2x18x72xf32, #tpu.memory_space<vmem>>, vector<2x16x72xf32>
    %21 = vector.shape_cast %20 : vector<2x16x72xf32> to vector<32x72xf32>
    %22 = arith.truncf %21 : vector<32x72xf32> to vector<32x72xbf16>
    %c2_27 = arith.constant 2 : index
    %c0_28 = arith.constant 0 : index
    %c0_29 = arith.constant 0 : index
    %23 = vector.load %arg3[%c2_27, %c0_28, %c0_29] : memref<3x72x128xbf16, #tpu.memory_space<vmem>>, vector<1x72x128xbf16>
    %24 = vector.shape_cast %23 : vector<1x72x128xbf16> to vector<72x128xbf16>
    %cst_30 = arith.constant dense<0.000000e+00> : vector<32x128xf32>
    %25 = tpu.matmul %22, %24, %cst_30 {dimension_numbers = #tpu.dot_dimension_numbers<[1], [0], [0], [1], [0, 0, 1, 1], [], []>} : vector<32x72xbf16>, vector<72x128xbf16>, vector<32x128xf32> -> vector<32x128xf32>
    %26 = arith.addf %13, %19 : vector<32x128xf32>
    %27 = arith.addf %26, %25 : vector<32x128xf32>
    %cst_31 = arith.constant dense<0.000000e+00> : vector<128xf32>
    %28 = vector.multi_reduction <add>, %27, %cst_31 [0] : vector<32x128xf32> to vector<128xf32>
    %29 = vector.shape_cast %28 : vector<128xf32> to vector<1x128xf32>
    %30 = arith.mulf %27, %27 : vector<32x128xf32>
    %cst_32 = arith.constant dense<0.000000e+00> : vector<128xf32>
    %31 = vector.multi_reduction <add>, %30, %cst_32 [0] : vector<32x128xf32> to vector<128xf32>
    %32 = vector.shape_cast %31 : vector<128xf32> to vector<1x128xf32>
    %33 = tpu.concatenate %29, %32 in 0 : vector<1x128xf32>, vector<1x128xf32> -> vector<2x128xf32>
    %cst_33 = arith.constant dense<0.000000e+00> : vector<2x128xf32>
    %34 = tpu.matmul %33, %4, %cst_33 {dimension_numbers = #tpu.dot_dimension_numbers<[1], [0], [0], [1], [0, 0, 1, 1], [], []>} : vector<2x128xf32>, vector<128x128xf32>, vector<2x128xf32> -> vector<2x128xf32>
    %cst_34 = arith.constant 0.001953125 : f32
    %35 = vector.broadcast %cst_34 : f32 to vector<2x128xf32>
    %36 = arith.mulf %34, %35 : vector<2x128xf32>
    %37 = vector.extract_strided_slice %36 {offsets = [0, 0], sizes = [1, 128], strides = [1, 1]} : vector<2x128xf32> to vector<1x128xf32>
    %38 = vector.extract_strided_slice %36 {offsets = [1, 0], sizes = [1, 128], strides = [1, 1]} : vector<2x128xf32> to vector<1x128xf32>
    %39 = arith.mulf %37, %37 : vector<1x128xf32>
    %40 = arith.subf %38, %39 : vector<1x128xf32>
    %c0_35 = arith.constant 0 : index
    %c0_36 = arith.constant 0 : index
    %41 = vector.load %arg4[%c0_35, %c0_36] : memref<1x128xf32, #tpu.memory_space<vmem>>, vector<1x128xf32>
    %cst_37 = arith.constant 9.99999974E-6 : f32
    %42 = vector.broadcast %cst_37 : f32 to vector<1x128xf32>
    %43 = arith.addf %40, %42 : vector<1x128xf32>
    %44 = math.rsqrt %43 : vector<1x128xf32>
    %45 = arith.mulf %41, %44 : vector<1x128xf32>
    %c0_38 = arith.constant 0 : index
    %c0_39 = arith.constant 0 : index
    %46 = vector.load %arg5[%c0_38, %c0_39] : memref<1x128xf32, #tpu.memory_space<vmem>>, vector<1x128xf32>
    %47 = arith.mulf %37, %45 : vector<1x128xf32>
    %48 = arith.subf %46, %47 : vector<1x128xf32>
    %49 = vector.broadcast %45 : vector<1x128xf32> to vector<32x128xf32>
    %50 = arith.mulf %27, %49 : vector<32x128xf32>
    %51 = vector.broadcast %48 : vector<1x128xf32> to vector<32x128xf32>
    %52 = arith.addf %50, %51 : vector<32x128xf32>
    %cst_40 = arith.constant 0.000000e+00 : f32
    %53 = vector.broadcast %cst_40 : f32 to vector<32x128xf32>
    %54 = arith.maximumf %52, %53 : vector<32x128xf32>
    %55 = vector.shape_cast %54 : vector<32x128xf32> to vector<2x16x128xf32>
    %c0_41 = arith.constant 0 : index
    %c1_42 = arith.constant 1 : index
    %c8 = arith.constant 8 : index
    %56 = vector.load %arg14[%c0_41, %c1_42, %c8] : memref<2x18x144xf32, #tpu.memory_space<vmem>>, vector<2x16x128xf32>
    tpu.vector_store %arg14[%c0_41, %c1_42, %c8], %55 {strides = array<i32>} : memref<2x18x144xf32, #tpu.memory_space<vmem>>, vector<2x16x128xf32>,
    %c0_43 = arith.constant 0 : index
    %c0_44 = arith.constant 0 : index
    %c0_45 = arith.constant 0 : index
    %57 = vector.load %arg14[%c0_43, %c0_44, %c0_45] : memref<2x18x144xf32, #tpu.memory_space<vmem>>, vector<2x16x144xf32>
    %58 = vector.shape_cast %57 : vector<2x16x144xf32> to vector<32x144xf32>
    %59 = arith.truncf %58 : vector<32x144xf32> to vector<32x144xbf16>
    %c0_46 = arith.constant 0 : index
    %c0_47 = arith.constant 0 : index
    %c0_48 = arith.constant 0 : index
    %60 = vector.load %arg6[%c0_46, %c0_47, %c0_48] : memref<3x144x128xbf16, #tpu.memory_space<vmem>>, vector<1x144x128xbf16>
    %61 = vector.shape_cast %60 : vector<1x144x128xbf16> to vector<144x128xbf16>
    %cst_49 = arith.constant dense<0.000000e+00> : vector<32x128xf32>
    %62 = tpu.matmul %59, %61, %cst_49 {dimension_numbers = #tpu.dot_dimension_numbers<[1], [0], [0], [1], [0, 0, 1, 1], [], []>} : vector<32x144xbf16>, vector<144x128xbf16>, vector<32x128xf32> -> vector<32x128xf32>
    %c0_50 = arith.constant 0 : index
    %c1_51 = arith.constant 1 : index
    %c0_52 = arith.constant 0 : index
    %63 = vector.load %arg14[%c0_50, %c1_51, %c0_52] : memref<2x18x144xf32, #tpu.memory_space<vmem>>, vector<2x16x144xf32>
    %64 = vector.shape_cast %63 : vector<2x16x144xf32> to vector<32x144xf32>
    %65 = arith.truncf %64 : vector<32x144xf32> to vector<32x144xbf16>
    %c1_53 = arith.constant 1 : index
    %c0_54 = arith.constant 0 : index
    %c0_55 = arith.constant 0 : index
    %66 = vector.load %arg6[%c1_53, %c0_54, %c0_55] : memref<3x144x128xbf16, #tpu.memory_space<vmem>>, vector<1x144x128xbf16>
    %67 = vector.shape_cast %66 : vector<1x144x128xbf16> to vector<144x128xbf16>
    %cst_56 = arith.constant dense<0.000000e+00> : vector<32x128xf32>
    %68 = tpu.matmul %65, %67, %cst_56 {dimension_numbers = #tpu.dot_dimension_numbers<[1], [0], [0], [1], [0, 0, 1, 1], [], []>} : vector<32x144xbf16>, vector<144x128xbf16>, vector<32x128xf32> -> vector<32x128xf32>
    %c0_57 = arith.constant 0 : index
    %c2_58 = arith.constant 2 : index
    %c0_59 = arith.constant 0 : index
    %69 = vector.load %arg14[%c0_57, %c2_58, %c0_59] : memref<2x18x144xf32, #tpu.memory_space<vmem>>, vector<2x16x144xf32>
    %70 = vector.shape_cast %69 : vector<2x16x144xf32> to vector<32x144xf32>
    %71 = arith.truncf %70 : vector<32x144xf32> to vector<32x144xbf16>
    %c2_60 = arith.constant 2 : index
    %c0_61 = arith.constant 0 : index
    %c0_62 = arith.constant 0 : index
    %72 = vector.load %arg6[%c2_60, %c0_61, %c0_62] : memref<3x144x128xbf16, #tpu.memory_space<vmem>>, vector<1x144x128xbf16>
    %73 = vector.shape_cast %72 : vector<1x144x128xbf16> to vector<144x128xbf16>
    %cst_63 = arith.constant dense<0.000000e+00> : vector<32x128xf32>
    %74 = tpu.matmul %71, %73, %cst_63 {dimension_numbers = #tpu.dot_dimension_numbers<[1], [0], [0], [1], [0, 0, 1, 1], [], []>} : vector<32x144xbf16>, vector<144x128xbf16>, vector<32x128xf32> -> vector<32x128xf32>
    %75 = arith.addf %62, %68 : vector<32x128xf32>
    %76 = arith.addf %75, %74 : vector<32x128xf32>
    %cst_64 = arith.constant dense<0.000000e+00> : vector<128xf32>
    %77 = vector.multi_reduction <add>, %76, %cst_64 [0] : vector<32x128xf32> to vector<128xf32>
    %78 = vector.shape_cast %77 : vector<128xf32> to vector<1x128xf32>
    %79 = arith.mulf %76, %76 : vector<32x128xf32>
    %cst_65 = arith.constant dense<0.000000e+00> : vector<128xf32>
    %80 = vector.multi_reduction <add>, %79, %cst_65 [0] : vector<32x128xf32> to vector<128xf32>
    %81 = vector.shape_cast %80 : vector<128xf32> to vector<1x128xf32>
    %82 = tpu.concatenate %78, %81 in 0 : vector<1x128xf32>, vector<1x128xf32> -> vector<2x128xf32>
    %cst_66 = arith.constant dense<0.000000e+00> : vector<2x128xf32>
    %83 = tpu.matmul %82, %4, %cst_66 {dimension_numbers = #tpu.dot_dimension_numbers<[1], [0], [0], [1], [0, 0, 1, 1], [], []>} : vector<2x128xf32>, vector<128x128xf32>, vector<2x128xf32> -> vector<2x128xf32>
    %cst_67 = arith.constant 0.001953125 : f32
    %84 = vector.broadcast %cst_67 : f32 to vector<2x128xf32>
    %85 = arith.mulf %83, %84 : vector<2x128xf32>
    %86 = vector.extract_strided_slice %85 {offsets = [0, 0], sizes = [1, 128], strides = [1, 1]} : vector<2x128xf32> to vector<1x128xf32>
    %87 = vector.extract_strided_slice %85 {offsets = [1, 0], sizes = [1, 128], strides = [1, 1]} : vector<2x128xf32> to vector<1x128xf32>
    %88 = arith.mulf %86, %86 : vector<1x128xf32>
    %89 = arith.subf %87, %88 : vector<1x128xf32>
    %c0_68 = arith.constant 0 : index
    %c0_69 = arith.constant 0 : index
    %90 = vector.load %arg7[%c0_68, %c0_69] : memref<1x128xf32, #tpu.memory_space<vmem>>, vector<1x128xf32>
    %cst_70 = arith.constant 9.99999974E-6 : f32
    %91 = vector.broadcast %cst_70 : f32 to vector<1x128xf32>
    %92 = arith.addf %89, %91 : vector<1x128xf32>
    %93 = math.rsqrt %92 : vector<1x128xf32>
    %94 = arith.mulf %90, %93 : vector<1x128xf32>
    %c0_71 = arith.constant 0 : index
    %c0_72 = arith.constant 0 : index
    %95 = vector.load %arg8[%c0_71, %c0_72] : memref<1x128xf32, #tpu.memory_space<vmem>>, vector<1x128xf32>
    %96 = arith.mulf %86, %94 : vector<1x128xf32>
    %97 = arith.subf %95, %96 : vector<1x128xf32>
    %98 = vector.broadcast %94 : vector<1x128xf32> to vector<32x128xf32>
    %99 = arith.mulf %76, %98 : vector<32x128xf32>
    %100 = vector.broadcast %97 : vector<1x128xf32> to vector<32x128xf32>
    %101 = arith.addf %99, %100 : vector<32x128xf32>
    %cst_73 = arith.constant 0.000000e+00 : f32
    %102 = vector.broadcast %cst_73 : f32 to vector<32x128xf32>
    %103 = arith.maximumf %101, %102 : vector<32x128xf32>
    %104 = vector.shape_cast %103 : vector<32x128xf32> to vector<2x16x128xf32>
    %c0_74 = arith.constant 0 : index
    %c1_75 = arith.constant 1 : index
    %c8_76 = arith.constant 8 : index
    %105 = vector.load %arg14[%c0_74, %c1_75, %c8_76] : memref<2x18x144xf32, #tpu.memory_space<vmem>>, vector<2x16x128xf32>
    tpu.vector_store %arg14[%c0_74, %c1_75, %c8_76], %104 {strides = array<i32>} : memref<2x18x144xf32, #tpu.memory_space<vmem>>, vector<2x16x128xf32>,
    %c0_77 = arith.constant 0 : index
    %c0_78 = arith.constant 0 : index
    %c0_79 = arith.constant 0 : index
    %106 = vector.load %arg14[%c0_77, %c0_78, %c0_79] : memref<2x18x144xf32, #tpu.memory_space<vmem>>, vector<2x16x144xf32>
    %107 = vector.shape_cast %106 : vector<2x16x144xf32> to vector<32x144xf32>
    %108 = arith.truncf %107 : vector<32x144xf32> to vector<32x144xbf16>
    %c0_80 = arith.constant 0 : index
    %c0_81 = arith.constant 0 : index
    %c0_82 = arith.constant 0 : index
    %109 = vector.load %arg9[%c0_80, %c0_81, %c0_82] : memref<3x144x128xbf16, #tpu.memory_space<vmem>>, vector<1x144x128xbf16>
    %110 = vector.shape_cast %109 : vector<1x144x128xbf16> to vector<144x128xbf16>
    %cst_83 = arith.constant dense<0.000000e+00> : vector<32x128xf32>
    %111 = tpu.matmul %108, %110, %cst_83 {dimension_numbers = #tpu.dot_dimension_numbers<[1], [0], [0], [1], [0, 0, 1, 1], [], []>} : vector<32x144xbf16>, vector<144x128xbf16>, vector<32x128xf32> -> vector<32x128xf32>
    %c0_84 = arith.constant 0 : index
    %c1_85 = arith.constant 1 : index
    %c0_86 = arith.constant 0 : index
    %112 = vector.load %arg14[%c0_84, %c1_85, %c0_86] : memref<2x18x144xf32, #tpu.memory_space<vmem>>, vector<2x16x144xf32>
    %113 = vector.shape_cast %112 : vector<2x16x144xf32> to vector<32x144xf32>
    %114 = arith.truncf %113 : vector<32x144xf32> to vector<32x144xbf16>
    %c1_87 = arith.constant 1 : index
    %c0_88 = arith.constant 0 : index
    %c0_89 = arith.constant 0 : index
    %115 = vector.load %arg9[%c1_87, %c0_88, %c0_89] : memref<3x144x128xbf16, #tpu.memory_space<vmem>>, vector<1x144x128xbf16>
    %116 = vector.shape_cast %115 : vector<1x144x128xbf16> to vector<144x128xbf16>
    %cst_90 = arith.constant dense<0.000000e+00> : vector<32x128xf32>
    %117 = tpu.matmul %114, %116, %cst_90 {dimension_numbers = #tpu.dot_dimension_numbers<[1], [0], [0], [1], [0, 0, 1, 1], [], []>} : vector<32x144xbf16>, vector<144x128xbf16>, vector<32x128xf32> -> vector<32x128xf32>
    %c0_91 = arith.constant 0 : index
    %c2_92 = arith.constant 2 : index
    %c0_93 = arith.constant 0 : index
    %118 = vector.load %arg14[%c0_91, %c2_92, %c0_93] : memref<2x18x144xf32, #tpu.memory_space<vmem>>, vector<2x16x144xf32>
    %119 = vector.shape_cast %118 : vector<2x16x144xf32> to vector<32x144xf32>
    %120 = arith.truncf %119 : vector<32x144xf32> to vector<32x144xbf16>
    %c2_94 = arith.constant 2 : index
    %c0_95 = arith.constant 0 : index
    %c0_96 = arith.constant 0 : index
    %121 = vector.load %arg9[%c2_94, %c0_95, %c0_96] : memref<3x144x128xbf16, #tpu.memory_space<vmem>>, vector<1x144x128xbf16>
    %122 = vector.shape_cast %121 : vector<1x144x128xbf16> to vector<144x128xbf16>
    %cst_97 = arith.constant dense<0.000000e+00> : vector<32x128xf32>
    %123 = tpu.matmul %120, %122, %cst_97 {dimension_numbers = #tpu.dot_dimension_numbers<[1], [0], [0], [1], [0, 0, 1, 1], [], []>} : vector<32x144xbf16>, vector<144x128xbf16>, vector<32x128xf32> -> vector<32x128xf32>
    %124 = arith.addf %111, %117 : vector<32x128xf32>
    %125 = arith.addf %124, %123 : vector<32x128xf32>
    %cst_98 = arith.constant dense<0.000000e+00> : vector<128xf32>
    %126 = vector.multi_reduction <add>, %125, %cst_98 [0] : vector<32x128xf32> to vector<128xf32>
    %127 = vector.shape_cast %126 : vector<128xf32> to vector<1x128xf32>
    %128 = arith.mulf %125, %125 : vector<32x128xf32>
    %cst_99 = arith.constant dense<0.000000e+00> : vector<128xf32>
    %129 = vector.multi_reduction <add>, %128, %cst_99 [0] : vector<32x128xf32> to vector<128xf32>
    %130 = vector.shape_cast %129 : vector<128xf32> to vector<1x128xf32>
    %131 = tpu.concatenate %127, %130 in 0 : vector<1x128xf32>, vector<1x128xf32> -> vector<2x128xf32>
    %cst_100 = arith.constant dense<0.000000e+00> : vector<2x128xf32>
    %132 = tpu.matmul %131, %4, %cst_100 {dimension_numbers = #tpu.dot_dimension_numbers<[1], [0], [0], [1], [0, 0, 1, 1], [], []>} : vector<2x128xf32>, vector<128x128xf32>, vector<2x128xf32> -> vector<2x128xf32>
    %cst_101 = arith.constant 0.001953125 : f32
    %133 = vector.broadcast %cst_101 : f32 to vector<2x128xf32>
    %134 = arith.mulf %132, %133 : vector<2x128xf32>
    %135 = vector.extract_strided_slice %134 {offsets = [0, 0], sizes = [1, 128], strides = [1, 1]} : vector<2x128xf32> to vector<1x128xf32>
    %136 = vector.extract_strided_slice %134 {offsets = [1, 0], sizes = [1, 128], strides = [1, 1]} : vector<2x128xf32> to vector<1x128xf32>
    %137 = arith.mulf %135, %135 : vector<1x128xf32>
    %138 = arith.subf %136, %137 : vector<1x128xf32>
    %c0_102 = arith.constant 0 : index
    %c0_103 = arith.constant 0 : index
    %139 = vector.load %arg10[%c0_102, %c0_103] : memref<1x128xf32, #tpu.memory_space<vmem>>, vector<1x128xf32>
    %cst_104 = arith.constant 9.99999974E-6 : f32
    %140 = vector.broadcast %cst_104 : f32 to vector<1x128xf32>
    %141 = arith.addf %138, %140 : vector<1x128xf32>
    %142 = math.rsqrt %141 : vector<1x128xf32>
    %143 = arith.mulf %139, %142 : vector<1x128xf32>
    %c0_105 = arith.constant 0 : index
    %c0_106 = arith.constant 0 : index
    %144 = vector.load %arg11[%c0_105, %c0_106] : memref<1x128xf32, #tpu.memory_space<vmem>>, vector<1x128xf32>
    %145 = arith.mulf %135, %143 : vector<1x128xf32>
    %146 = arith.subf %144, %145 : vector<1x128xf32>
    %147 = vector.broadcast %143 : vector<1x128xf32> to vector<32x128xf32>
    %148 = arith.mulf %125, %147 : vector<32x128xf32>
    %149 = vector.broadcast %146 : vector<1x128xf32> to vector<32x128xf32>
    %150 = arith.addf %148, %149 : vector<32x128xf32>
    %cst_107 = arith.constant 0.000000e+00 : f32
    %151 = vector.broadcast %cst_107 : f32 to vector<32x128xf32>
    %152 = arith.maximumf %150, %151 : vector<32x128xf32>
    %c0_108 = arith.constant 0 : index
    %c0_109 = arith.constant 0 : index
    %153 = vector.load %arg12[%c0_108, %c0_109] : memref<32x128xf32, #tpu.memory_space<vmem>>, vector<32x128xf32>
    tpu.vector_store %arg12[%c0_108, %c0_109], %152 {strides = array<i32>} : memref<32x128xf32, #tpu.memory_space<vmem>>, vector<32x128xf32>,
    return
  }
  func.func @transform_0(%arg0: i32) -> (i32, i32) {
    %c0_i32 = arith.constant 0 : i32
    %c0_i32_0 = arith.constant 0 : i32
    %c0_i32_1 = arith.constant 0 : i32
    return %c0_i32, %c0_i32_0 : i32, i32
  }
  func.func @transform_1(%arg0: i32) -> (i32, i32) {
    %c0_i32 = arith.constant 0 : i32
    %c0_i32_0 = arith.constant 0 : i32
    %c0_i32_1 = arith.constant 0 : i32
    return %c0_i32, %c0_i32_0 : i32, i32
  }
  func.func @transform_2(%arg0: i32) -> (i32, i32, i32) {
    %c0_i32 = arith.constant 0 : i32
    %c0_i32_0 = arith.constant 0 : i32
    %c0_i32_1 = arith.constant 0 : i32
    %c0_i32_2 = arith.constant 0 : i32
    return %c0_i32, %c0_i32_0, %c0_i32_1 : i32, i32, i32
  }
  func.func @transform_3(%arg0: i32) -> (i32, i32) {
    %c0_i32 = arith.constant 0 : i32
    %c0_i32_0 = arith.constant 0 : i32
    %c0_i32_1 = arith.constant 0 : i32
    return %c0_i32, %c0_i32_0 : i32, i32
  }
  func.func @transform_4(%arg0: i32) -> (i32, i32) {
    %c0_i32 = arith.constant 0 : i32
    %c0_i32_0 = arith.constant 0 : i32
    %c0_i32_1 = arith.constant 0 : i32
    return %c0_i32, %c0_i32_0 : i32, i32
  }
  func.func @transform_5(%arg0: i32) -> (i32, i32, i32) {
    %c0_i32 = arith.constant 0 : i32
    %c0_i32_0 = arith.constant 0 : i32
    %c0_i32_1 = arith.constant 0 : i32
    %c0_i32_2 = arith.constant 0 : i32
    return %c0_i32, %c0_i32_0, %c0_i32_1 : i32, i32, i32
  }
  func.func @transform_6(%arg0: i32) -> (i32, i32) {
    %c0_i32 = arith.constant 0 : i32
    %c0_i32_0 = arith.constant 0 : i32
    %c0_i32_1 = arith.constant 0 : i32
    return %c0_i32, %c0_i32_0 : i32, i32
  }
  func.func @transform_7(%arg0: i32) -> (i32, i32) {
    %c0_i32 = arith.constant 0 : i32
    %c0_i32_0 = arith.constant 0 : i32
    %c0_i32_1 = arith.constant 0 : i32
    return %c0_i32, %c0_i32_0 : i32, i32
  }
  func.func @transform_8(%arg0: i32) -> (i32, i32, i32) {
    %c0_i32 = arith.constant 0 : i32
    %c0_i32_0 = arith.constant 0 : i32
    %c0_i32_1 = arith.constant 0 : i32
    %c0_i32_2 = arith.constant 0 : i32
    return %c0_i32, %c0_i32_0, %c0_i32_1 : i32, i32, i32
  }
  func.func @transform_9(%arg0: i32) -> (i32, i32) {
    %c0_i32 = arith.constant 0 : i32
    %c0_i32_0 = arith.constant 0 : i32
    %c0_i32_1 = arith.constant 0 : i32
    return %c0_i32, %c0_i32_0 : i32, i32
  }
  func.func @transform_10(%arg0: i32) -> (i32, i32) {
    %c0_i32 = arith.constant 0 : i32
    %c0_i32_0 = arith.constant 0 : i32
    %c0_i32_1 = arith.constant 0 : i32
    return %c0_i32, %c0_i32_0 : i32, i32
  }
  func.func @transform_11(%arg0: i32) -> (i32, i32) {
    %c0_i32 = arith.constant 0 : i32
    %c0_i32_0 = arith.constant 0 : i32
    %c0_i32_1 = arith.constant 0 : i32
    return %c0_i32, %c0_i32_0 : i32, i32
  }
}

</mosaic_0001>

<bundles_post_ra>
// kernel: tpu_custom_call.1
= control target key start
LH: loop header
LB: loop body
LE: loop exit
PB: predicated region body
PF: predicated region fallthrough
CT: control target
= control target key end

     0   :  { %16 = vsyncpa [#allocation5], 0  ;;  %s2591_s0 = inlined_call_operand.hbm [shape: f32[32,64], index: 0, kind: input, shape index: {}]   ;;  %s2592_s1 = inlined_call_operand.hbm [shape: f32[128,128], index: 1, kind: input, shape index: {}]   ;;  %s2593_s2 = inlined_call_operand.hbm [shape: bf16[3,72,128], index: 2, kind: input, shape index: {}]   ;;  %s2594_s3 = inlined_call_operand.vmem [shape: f32[1,128], index: 3, kind: input, shape index: {}]   ;;  %s2595_s4 = inlined_call_operand.vmem [shape: f32[1,128], index: 4, kind: input, shape index: {}]   ;;  %s2596_s5 = inlined_call_operand.hbm [shape: bf16[3,144,128], index: 5, kind: input, shape index: {}]   ;;  %s2597_s6 = inlined_call_operand.vmem [shape: f32[1,128], index: 6, kind: input, shape index: {}]   ;;  %s2598_s7 = inlined_call_operand.vmem [shape: f32[1,128], index: 7, kind: input, shape index: {}]   ;;  %s2599_s8 = inlined_call_operand.hbm [shape: bf16[3,144,128], index: 8, kind: input, shape index: {}]   ;;  %s2600_s9 = inlined_call_operand.vmem [shape: f32[1,128], index: 9, kind: input, shape index: {}]   ;;  %s2601_s10 = inlined_call_operand.vmem [shape: f32[1,128], index: 10, kind: input, shape index: {}]   ;;  %s2602_s11 = inlined_call_operand.hbm [shape: f32[32,128], index: 11, kind: output, shape index: {}]  }
   0x1   :  { %17 = vsyncpa [#allocation8], 0 }
   0x2   :  { %18 = vsyncpa [#allocation11], 0 }
   0x3   :  { %19 = vsyncpa [#allocation6], 0  ;;  %s37_s19 = sshll.u32 %s2592_s1, 4  ;;  %s2226_s20 = smov [#allocation7]   ;;  %s38_s19 = int_to_ptr.hbm [resolvable:$true] %s37_s19 }
   0x4   :  { %s39_s21 = sshll.u32 %s2226_s20, 4  ;;  %s2227_s22 = smov 128   ;;  %s40_s21 = int_to_ptr.vmem [resolvable:$true] %s39_s21 }
   0x5   :  { %s2228_s23 = smov 8   ;;  %s67_s26 = sshll.u32 %s2596_s5, 4  ;;  %s68_s26 = int_to_ptr.hbm [resolvable:$true] %s67_s26 }
   0x6   :  { %45 = dma.hbm_to_vmem [thread:$0]  %s38_s19, 2048, %s40_s21, [#allocation8], %s2227_s22, %s2227_s22, %s2228_s23  }
   0x7   :  { %s2229_s27 = smov [#allocation10]   ;;  %s24_s1 = sshll.u32 %s2591_s0, 4  ;;  %s25_s1 = int_to_ptr.hbm [resolvable:$true] %s24_s1 }
   0x8   :  { %s69_s28 = sshll.u32 %s2229_s27, 4  ;;  %s2230_s12 = smov 64   ;;  %s70_s28 = int_to_ptr.vmem [resolvable:$true] %s69_s28 }
   0x9   :  { %s2231_s13 = smov 4   ;;  %s50_s16 = sshll.u32 %s2593_s2, 4  ;;  %s51_s16 = int_to_ptr.hbm [resolvable:$true] %s50_s16 }
   0xa   :  { %75 = dma.hbm_to_vmem [thread:$0]  %s68_s26, 3456, %s70_s28, [#allocation11], %s2230_s12, %s2230_s12, %s2231_s13  }
   0xb   :  { %s2232_s17 = smov [#allocation4]   ;;  %s2233_s5 = smov [#allocation9]  }
   0xc   :  { %s26_s18 = sshll.u32 %s2232_s17, 4  ;;  %s52_s0 = sshll.u32 %s2233_s5, 4  ;;  %s27_s18 = int_to_ptr.vmem [resolvable:$true] %s26_s18  ;;  %s53_s0 = int_to_ptr.vmem [resolvable:$true] %s52_s0 }
   0xd   :  { %32 = dma.hbm_to_vmem [thread:$0]  %s25_s1, 512, %s27_s18, [#allocation5], %s2227_s22, %s2227_s22, %s2228_s23  }
   0xe   :  { %s84_s21 = sshll.u32 %s2599_s8, 4  ;;  %s2234_s24 = smov [#allocation12]   ;;  %s85_s21 = int_to_ptr.hbm [resolvable:$true] %s84_s21 }
   0xf   :  { %58 = dma.hbm_to_vmem [thread:$0]  %s51_s16, 1728, %s53_s0, [#allocation8], %s2230_s12, %s2230_s12, %s2231_s13  }
  0x10   :  { %s86_s2 = sshll.u32 %s2234_s24, 4  ;;  %s87_s2 = int_to_ptr.vmem [resolvable:$true] %s86_s2 }
  0x11   :  { %92 = dma.hbm_to_vmem [thread:$0]  %s85_s21, 3456, %s87_s2, [#allocation11], %s2230_s12, %s2230_s12, %s2231_s13  }
  0x12   :  { %2218 = dma.done.wait [#allocation5], 512  }
  0x13   :  { %2219 = vsyncadd [#allocation5], 4294966784 }
  0x14   :  { %2220 = dma.done.wait [#allocation8], 3776  }
  0x15   :  { %2221 = vsyncadd [#allocation8], 4294963520 }
  0x16   :  { %2222 = dma.done.wait [#allocation11], 6912  }
  0x17   :  { %2223 = vsyncadd [#allocation11], 4294960384  ;;  %vm118_vm0 = vcmask 588800   ;;  %v2235_v0 = vmov 0.0   ;;  %v156_v1 = vld [vmem:[#allocation4] sm:$0xff]  ;;  %v158_v2 = vld [vmem:[#allocation4 + $0x10] sm:$0xff] }
  0x18   :  { %119 = vst.msk [vmem:[#allocation2] sm:$0xff] %vm118_vm0, %v2235_v0  ;;  %164 = vrot.lane.b32.xlu0 %v156_v1, %s2231_s13  ;;  %168 = vrot.lane.b32.xlu1 %v158_v2, %s2231_s13  ;;  %v211_v3 = vld [vmem:[#allocation9 + $0x44] sm:$0xf]  ;;  %v283_v4 = vld [vmem:[#allocation9 + $0x68] sm:$0xf]  ;;  %vm245_vm1 = vcmask 1043456  }
  0x19   :  { %120 = vst.msk [vmem:[#allocation2 + $0x8] sm:$0xff] %vm118_vm0, %v2235_v0  ;;  %v229_v5 = vunpack.c.l.b16 %v211_v3  ;;  %v301_v6 = vunpack.c.l.b16 %v283_v4  ;;  %v195_v7 = vld [vmem:[#allocation9 + $0x20] sm:$0xf]  ;;  %v157_v12 = vld [vmem:[#allocation4 + $0x8] sm:$0xff]  ;;  %v159_v13 = vld [vmem:[#allocation4 + $0x18] sm:$0xff]  ;;  %vm121_vm2 = vcmask 582656  }
  0x1a   :  { %123 = vst.msk [vmem:[#allocation2 + $0x18] sm:$0xff] %vm118_vm0, %v2235_v0  ;;  %v356_v8 = vunpack.c.l.b16 %v195_v7  ;;  %v1997_v17 = vld [vmem:[#allocation9 + $0x3c] sm:$0xff]  ;;  %v1996_v20 = vld [vmem:[#allocation9 + $0x34] sm:$0xff]  ;;  %v1995_v23 = vld [vmem:[#allocation9 + $0x2c] sm:$0xff]  ;;  %vm176_vm3 = vcmask 556064   ;;  %vm420_vm4 = vcmask 1040384  }
  0x1b   :  { %124 = vst.msk [vmem:[#allocation2 + $0x20] sm:$0xff] %vm118_vm0, %v2235_v0  ;;  %v234_v9 = vpack.c.b16 %v229_v5, %v229_v5  ;;  %v306_v10 = vpack.c.b16 %v301_v6, %v301_v6  ;;  %v2001_v18 = vld [vmem:[#allocation9 + $0x60] sm:$0xff]  ;;  %v1993_v19 = vld [vmem:[#allocation9 + $0x18] sm:$0xff]  ;;  %v1992_v22 = vld [vmem:[#allocation9 + $0x10] sm:$0xff]  ;;  %vm127_vm8 = vcmask 130048   ;;  %vm132_vm9 = vcmask 123904  }
  0x1c   :  { %126 = vst [vmem:[#allocation3] sm:$0xff] %v2235_v0  ;;  %v361_v11 = vpack.c.b16 %v356_v8, %v356_v8  ;;  %v2000_v21 = vld [vmem:[#allocation9 + $0x58] sm:$0xff]  ;;  %v1999_v24 = vld [vmem:[#allocation9 + $0x50] sm:$0xff]  ;;  %v1991_v25 = vld [vmem:[#allocation9 + $0x8] sm:$0xff]  ;;  %vm515_vm10 = vcmask 1047617   ;;  %vm517_vm11 = vcmask 64513  }
  0x1d   :  { %129 = vst [vmem:[#allocation3 + $0x10] sm:$0xff] %v2235_v0  ;;  %v247_v14 = vsel %vm245_vm1, %v234_v9, 0  ;;  %v318_v15 = vsel %vm245_vm1, %v306_v10, 0  ;;  %v1994_v26 = vld [vmem:[#allocation9 + $0x24] sm:$0xff]  ;;  %v2347_v51 = vld [vmem:[#allocation7 + $0x78] sm:$0xff]  ;;  %v2350_v52 = vld [vmem:[#allocation7 + $0x70] sm:$0xff] }
  0x1e   :  { %131 = vst [vmem:[#allocation3 + $0x20] sm:$0x3] %v2235_v0  ;;  %252 = vmatpush.bf16.msra.mxu0 %v247_v14  ;;  %323 = vmatpush.bf16.msra.mxu1 %v318_v15  ;;  %v373_v16 = vsel %vm245_vm1, %v361_v11, 0  ;;  %v1998_v27 = vld [vmem:[#allocation9 + $0x48] sm:$0xff]  ;;  %v1990_v28 = vld [vmem:[#allocation9] sm:$0xff]  ;;  %v2359_v55 = vld [vmem:[#allocation7 + $0x58] sm:$0xff] }
  0x1f   :  { %134 = vst [vmem:[#allocation3 + $0x30] sm:$0xff] %v2235_v0  ;;  %378 = vmatpush.bf16.msra.mxu2 %v373_v16  ;;  %422 = vmatpush.msra.mxu3 %v2347_v51  ;;  %v2353_v53 = vld [vmem:[#allocation7 + $0x68] sm:$0xff]  ;;  %v2356_v54 = vld [vmem:[#allocation7 + $0x60] sm:$0xff]  ;;  %v2362_v56 = vld [vmem:[#allocation7 + $0x50] sm:$0xff]  ;;  %vm519_vm12 = vcmask 1047616   ;;  %vm521_vm13 = vcmask 64512  }
  0x20   :  { %136 = vst [vmem:[#allocation3 + $0x40] sm:$0xff] %v2235_v0  ;;  %166 = vrot.lane.b32.xlu0 %v157_v12, %s2231_s13  ;;  %170 = vrot.lane.b32.xlu1 %v159_v13, %s2231_s13  ;;  %v2365_v58 = vld [vmem:[#allocation7 + $0x48] sm:$0xff]  ;;  %v2368_v60 = vld [vmem:[#allocation7 + $0x40] sm:$0xff]  ;;  %v2371_v61 = vld [vmem:[#allocation7 + $0x38] sm:$0xff]  ;;  %vm523_vm14 = vcmask 1040448   ;;  %vm525_vm15 = vcmask 57344  }
  0x21   :  { %138 = vst [vmem:[#allocation3 + $0x50] sm:$0x3] %v2235_v0  ;;  %423 = vmatpush.msra.mxu3 %v2350_v52  ;;  %v2374_v62 = vld [vmem:[#allocation7 + $0x30] sm:$0xff]  ;;  %v2376_v1 = vld [vmem:[#allocation7 + $0x28] sm:$0xff]  ;;  %v2379_v2 = vld [vmem:[#allocation7 + $0x20] sm:$0xff]  ;;  %vm749_vm1 = vcmask 1045504  }
  0x22   :  { %253 = vmatpush.bf16.msra.mxu0 %v1997_v17  ;;  %324 = vmatpush.bf16.msra.mxu1 %v2001_v18  ;;  %122 = vst.msk [vmem:[#allocation2 + $0x10] sm:$0x3] %vm121_vm2, %v2235_v0  ;;  %v2382_v4 = vld [vmem:[#allocation7 + $0x18] sm:$0xff]  ;;  %v2385_v6 = vld [vmem:[#allocation7 + $0x10] sm:$0xff]  ;;  %v2388_v8 = vld [vmem:[#allocation7 + $0x8] sm:$0xff]  ;;  %s1693_s14 = sshll.u32 %s2602_s11, 4  ;;  %s1694_s14 = int_to_ptr.hbm [resolvable:$true] %s1693_s14 }
  0x23   :  { %379 = vmatpush.bf16.msra.mxu2 %v1993_v19  ;;  %125 = vst.msk [vmem:[#allocation2 + $0x28] sm:$0x3] %vm121_vm2, %v2235_v0  ;;  %424 = vmatpush.msra.mxu3 %v2353_v53  ;;  %v2391_v9 = vld [vmem:[#allocation7] sm:$0xff] }
  0x24   :  { %128 = vst.msk [vmem:[#allocation3 + $0x8] sm:$0xff] %vm127_vm8, %v2235_v0 }
  0x25   :  { %425 = vmatpush.msra.mxu3 %v2356_v54  ;;  %130 = vst.msk [vmem:[#allocation3 + $0x18] sm:$0xff] %vm127_vm8, %v2235_v0 }
  0x26   :  { %254 = vmatpush.bf16.msra.mxu0 %v1996_v20  ;;  %325 = vmatpush.bf16.msra.mxu1 %v2000_v21  ;;  %135 = vst.msk [vmem:[#allocation3 + $0x38] sm:$0xff] %vm127_vm8, %v2235_v0 }
  0x27   :  { %380 = vmatpush.bf16.msra.mxu2 %v1992_v22  ;;  %426 = vmatpush.msra.mxu3 %v2359_v55  ;;  %137 = vst.msk [vmem:[#allocation3 + $0x48] sm:$0xff] %vm127_vm8, %v2235_v0 }
  0x28   :  { %133 = vst.msk [vmem:[#allocation3 + $0x28] sm:$0x3] %vm132_vm9, %v2235_v0 }
  0x29   :  { %427 = vmatpush.msra.mxu3 %v2362_v56  ;;  %139 = vst.msk [vmem:[#allocation3 + $0x58] sm:$0x3] %vm132_vm9, %v2235_v0  ;;  %v2009_v0 = vld [vmem:[#allocation10 + $0x38] sm:$0xff] }
  0x2a   :  { %255 = vmatpush.bf16.msra.mxu0 %v1995_v23  ;;  %326 = vmatpush.bf16.msra.mxu1 %v1999_v24 }
  0x2b   :  { %381 = vmatpush.bf16.msra.mxu2 %v1991_v25  ;;  %428 = vmatpush.msra.mxu3 %v2365_v58 }
  0x2d   :  { %429 = vmatpush.msra.mxu3 %v2368_v60 }
  0x2e   :  { %256 = vmatpush.bf16.msra.mxu0 %v1994_v26  ;;  %327 = vmatpush.bf16.msra.mxu1 %v1998_v27 }
  0x2f   :  { %382 = vmatpush.bf16.msra.mxu2 %v1990_v28  ;;  %430 = vmatpush.msra.mxu3 %v2371_v61 }
  0x31   :  { %431 = vmatpush.msra.mxu3 %v2374_v62 }
  0x33   :  { %432 = vmatpush.msra.mxu3 %v2376_v1 }
  0x35   :  { %433 = vmatpush.msra.mxu3 %v2379_v2 }
  0x37   :  { %434 = vmatpush.msra.mxu3 %v2382_v4 }
  0x39   :  { %435 = vmatpush.msra.mxu3 %v2385_v6 }
  0x3b   :  { %436 = vmatpush.msra.mxu3 %v2388_v8 }
  0x3d   :  { %437 = vmatpush.msra.mxu3 %v2391_v9 }
  0x8a   :  { %v165_v29 = vpop.permute.xlu0 %164  ;;  %v169_v30 = vpop.permute.xlu1 %168 }
  0x8b   :  { %177 = vst.msk [vmem:[#allocation2 + $0x1] sm:$0xff] %vm176_vm3, %v165_v29 }
  0x8c   :  { %179 = vst.msk [vmem:[#allocation2 + $0x19] sm:$0xff] %vm176_vm3, %v169_v30 }
  0x92   :  { %v167_v31 = vpop.permute.xlu0 %166  ;;  %v171_v32 = vpop.permute.xlu1 %170  ;;  %v196_v33 = vld [vmem:[#allocation2 + $0x1] sm:$0xff] }
  0x93   :  { %178 = vst.msk [vmem:[#allocation2 + $0x9] sm:$0xff] %vm176_vm3, %v167_v31  ;;  %v181_v39 = vld [vmem:[#allocation2] sm:$0xff]  ;;  %v183_v46 = vld [vmem:[#allocation2 + $0x18] sm:$0xff] }
  0x94   :  { %180 = vst.msk [vmem:[#allocation2 + $0x21] sm:$0xff] %vm176_vm3, %v171_v32  ;;  %v198_v42 = vld [vmem:[#allocation2 + $0x19] sm:$0xff] }
  0x9a   :  { %v197_v34 = vld [vmem:[#allocation2 + $0x9] sm:$0xff] }
  0x9b   :  { %v268_v35 = vld [vmem:[#allocation2 + $0x2] sm:$0xff]  ;;  %v269_v36 = vld [vmem:[#allocation2 + $0xa] sm:$0xff]  ;;  %v200_v37 = vpack.c.bf16 %v197_v34, %v196_v33  ;;  %v270_v44 = vld [vmem:[#allocation2 + $0x1a] sm:$0xff] }
  0x9c   :  { %v272_v38 = vpack.c.bf16 %v269_v36, %v268_v35  ;;  %v182_v40 = vld [vmem:[#allocation2 + $0x8] sm:$0xff]  ;;  %v184_v47 = vld [vmem:[#allocation2 + $0x20] sm:$0xff] }
  0x9d   :  { %v185_v41 = vpack.c.bf16 %v182_v40, %v181_v39  ;;  %1724 = vmatmul.msk.bf16.vlgmr.msra.gmra.mxu0 %vm118_vm0, %v200_v37  ;;  %v199_v43 = vld [vmem:[#allocation2 + $0x21] sm:$0xff]  ;;  %v186_v50 = vpack.c.bf16 %v184_v47, %v183_v46 }
  0x9e   :  { %1742 = vmatmul.msk.bf16.vlgmr.msra.gmra.mxu1 %vm118_vm0, %v272_v38  ;;  %v271_v45 = vld [vmem:[#allocation2 + $0x22] sm:$0xff]  ;;  %v201_v48 = vpack.c.bf16 %v199_v43, %v198_v42 }
  0x9f   :  { %1760 = vmatmul.msk.bf16.vlgmr.msra.gmra.mxu2 %vm118_vm0, %v185_v41  ;;  %v273_v49 = vpack.c.bf16 %v271_v45, %v270_v44 }
  0xad   :  { %1725 = vmatmul.msk.bf16.gmra.mxu0 %vm118_vm0, %v201_v48 }
  0xae   :  { %1743 = vmatmul.msk.bf16.gmra.mxu1 %vm118_vm0, %v273_v49 }
  0xaf   :  { %1761 = vmatmul.msk.bf16.gmra.mxu2 %vm118_vm0, %v186_v50  ;;  %vm583_vm0 = vcmask 1046528  }
 0x11a   :  { %v258_v57 = vpop.f32.mrf.mxu0 }
 0x11b   :  { %v329_v59 = vpop.f32.mrf.mxu1 }
 0x122   :  { %v384_v63 = vpop.f32.mrf.mxu2  ;;  %v260_v3 = vpop.f32.mrf.mxu0 }
 0x123   :  { %v331_v5 = vpop.f32.mrf.mxu1  ;;  %v385_v14 = vadd.f32 %v384_v63, %v258_v57 }
 0x125   :  { %v2397_v17 = vadd.f32 %v385_v14, %v329_v59 }
 0x127   :  { %v407_v22 = vmul.f32 %v2397_v17, %v2397_v17 }
 0x12a   :  { %v386_v7 = vpop.f32.mrf.mxu2  ;;  %v263_v10 = vpop.f32.mrf.mxu0 }
 0x12b   :  { %v387_v11 = vadd.f32 %v386_v7, %v260_v3  ;;  %v334_v12 = vpop.f32.mrf.mxu1 }
 0x12d   :  { %v2395_v16 = vadd.f32 %v387_v11, %v331_v5 }
 0x12f   :  { %v408_v19 = vmul.f32 %v2395_v16, %v2395_v16  ;;  %v398_v23 = vadd.f32 %v2395_v16, %v2397_v17 }
 0x131   :  { %v411_v27 = vadd.f32 %v408_v19, %v407_v22  ;;  %v466_v19 = vld [vmem:[%s2595_s4] sm:$0x1] }
 0x132   :  { %v389_v13 = vpop.f32.mrf.mxu2  ;;  %v265_v20 = vpop.f32.mrf.mxu0 }
 0x133   :  { %v390_v15 = vadd.f32 %v389_v13, %v263_v10  ;;  %v336_v26 = vpop.f32.mrf.mxu1  ;;  %v448_v13 = vld [vmem:[%s2594_s3] sm:$0x1] }
 0x135   :  { %v396_v18 = vadd.f32 %v390_v15, %v334_v12 }
 0x137   :  { %v409_v24 = vmul.f32 %v396_v18, %v396_v18  ;;  %v399_v28 = vadd.f32 %v398_v23, %v396_v18 }
 0x139   :  { %v412_v30 = vadd.f32 %v411_v27, %v409_v24 }
 0x13a   :  { %v391_v21 = vpop.f32.mrf.mxu2 }
 0x13b   :  { %v392_v25 = vadd.f32 %v391_v21, %v265_v20 }
 0x13d   :  { %v397_v29 = vadd.f32 %v392_v25, %v336_v26 }
 0x13f   :  { %v400_v31 = vadd.f32 %v399_v28, %v397_v29  ;;  %v410_v32 = vmul.f32 %v397_v29, %v397_v29 }
 0x141   :  { %v401_v33 = vrot.slane %v400_v31, 4  ;;  %v413_v34 = vadd.f32 %v412_v30, %v410_v32 }
 0x143   :  { %v402_v35 = vadd.f32 %v401_v33, %v400_v31  ;;  %v414_v36 = vrot.slane %v413_v34, 4 }
 0x145   :  { %v403_v37 = vrot.slane %v402_v35, 2  ;;  %v415_v38 = vadd.f32 %v414_v36, %v413_v34 }
 0x147   :  { %v404_v39 = vadd.f32 %v403_v37, %v402_v35  ;;  %v416_v40 = vrot.slane %v415_v38, 2 }
 0x149   :  { %v405_v41 = vrot.slane %v404_v39, 1  ;;  %v417_v42 = vadd.f32 %v416_v40, %v415_v38  ;;  %v2027_v40 = vld [vmem:[#allocation10 + $0xc8] sm:$0xff] }
 0x14a   :  { %861 = vmatpush.bf16.msrb.mxu1 %v2027_v40 }
 0x14b   :  { %v418_v43 = vrot.slane %v417_v42, 1  ;;  %v406_v44 = vadd.f32 %v405_v41, %v404_v39  ;;  %v2018_v39 = vld [vmem:[#allocation10 + $0x80] sm:$0xff]  ;;  %v2017_v41 = vld [vmem:[#allocation10 + $0x78] sm:$0xff] }
 0x14c   :  { %695 = vmatpush.bf16.msrb.mxu0 %v2018_v39 }
 0x14d   :  { %v419_v45 = vadd.f32 %v418_v43, %v417_v42  ;;  %v2026_v42 = vld [vmem:[#allocation10 + $0xc0] sm:$0xff]  ;;  %v2016_v43 = vld [vmem:[#allocation10 + $0x70] sm:$0xff] }
 0x14e   :  { %862 = vmatpush.bf16.msrb.mxu1 %v2026_v42 }
 0x14f   :  { %v421_v46 = vsel %vm420_vm4, %v406_v44, %v419_v45  ;;  %v2025_v44 = vld [vmem:[#allocation10 + $0xb8] sm:$0xff]  ;;  %v2015_v45 = vld [vmem:[#allocation10 + $0x68] sm:$0xff] }
 0x150   :  { %438 = vmatmul.f32.vlgmr.msra.gmra.mxu3 %v421_v46  ;;  %696 = vmatpush.bf16.msrb.mxu0 %v2017_v41  ;;  %v2024_v46 = vld [vmem:[#allocation10 + $0xb0] sm:$0xff] }
 0x152   :  { %863 = vmatpush.bf16.msrb.mxu1 %v2025_v44 }
 0x154   :  { %697 = vmatpush.bf16.msrb.mxu0 %v2016_v43 }
 0x156   :  { %864 = vmatpush.bf16.msrb.mxu1 %v2024_v46 }
 0x158   :  { %698 = vmatpush.bf16.msrb.mxu0 %v2015_v45 }
 0x1d3   :  { %v439_v47 = vpop.f32.mrf.mxu3 }
 0x1d4   :  { %v442_v48 = vmul.f32 0.001953125, %v439_v47  ;;  %v2014_v47 = vld [vmem:[#allocation10 + $0x60] sm:$0xff] }
 0x1d5   :  { %699 = vmatpush.bf16.msrb.mxu0 %v2014_v47 }
 0x1d6   :  { %v443_v49 = vmul.f32 %v442_v48, %v442_v48 }
 0x1d8   :  { %v445_v50 = vrot.slane %v443_v49, 7  ;;  %v2013_v49 = vld [vmem:[#allocation10 + $0x58] sm:$0xff] }
 0x1d9   :  { %700 = vmatpush.bf16.msrb.mxu0 %v2013_v49 }
 0x1da   :  { %v447_v57 = vsub.f32 %v442_v48, %v445_v50  ;;  %v2022_v50 = vld [vmem:[#allocation10 + $0xa0] sm:$0xff] }
 0x1dc   :  { %v449_v59 = vadd.f32 1e-05, %v447_v57  ;;  %v2019_v57 = vld [vmem:[#allocation10 + $0x88] sm:$0xff] }
 0x1dd   :  { %721 = vmatpush.bf16.msrb.mxu3 %v2019_v57 }
 0x1de   :  { %2067 = vrsqrt.f32 %v449_v59  ;;  %vm456_vm6 = vweird.f32 %v449_v59 }
 0x1e1   :  { %959 = vmatpush.bf16.msra.mxu3 %v2009_v0 }
 0x1e4   :  { %v2068_v63 = vpop.eup %2067 }
 0x1e5   :  { %v451_v3 = vmul.f32 %v2068_v63, %v449_v59  ;;  %vm457_vm5 = vweird.f32 %v2068_v63  ;;  %v2012_v59 = vld [vmem:[#allocation10 + $0x50] sm:$0xff] }
 0x1e6   :  { %vm458_vm7 = vmor %vm456_vm6, %vm457_vm5  ;;  %701 = vmatpush.bf16.msrb.mxu0 %v2012_v59 }
 0x1e7   :  { %v452_v5 = vmul.f32 %v2068_v63, %v451_v3 }
 0x1e9   :  { %v453_v7 = vmul.f32 0.5, %v452_v5  ;;  %v2011_v5 = vld [vmem:[#allocation10 + $0x48] sm:$0xff] }
 0x1ea   :  { %702 = vmatpush.bf16.msrb.mxu0 %v2011_v5 }
 0x1eb   :  { %v454_v10 = vsub.f32 1.5, %v453_v7  ;;  %v2020_v7 = vld [vmem:[#allocation10 + $0x90] sm:$0xff] }
 0x1ed   :  { %v455_v11 = vmul.f32 %v2068_v63, %v454_v10  ;;  %v2028_v10 = vld [vmem:[#allocation10 + $0xd0] sm:$0xff] }
 0x1ee   :  { %887 = vmatpush.bf16.msrb.mxu2 %v2028_v10 }
 0x1ef   :  { %v459_v12 = vsel %vm458_vm7, %v2068_v63, %v455_v11  ;;  %v2021_v63 = vld [vmem:[#allocation10 + $0x98] sm:$0xff] }
 0x1f0   :  { %461 = vst [vmem:[#allocation1] sm:$0xff] %v459_v12  ;;  %v2008_v12 = vld [vmem:[#allocation10 + $0x30] sm:$0xff] }
 0x1f1   :  { %960 = vmatpush.bf16.msra.mxu3 %v2008_v12 }
 0x1f7   :  { %v463_v14 = vld [vmem:[#allocation1 + $0x1] ss:$9 sm:$0xff] }
 0x1f8   :  { %v465_v15 = vmul.f32 %v463_v14, %v448_v13  ;;  %v2010_v13 = vld [vmem:[#allocation10 + $0x40] sm:$0xff]  ;;  %v2007_v14 = vld [vmem:[#allocation10 + $0x28] sm:$0xff] }
 0x1f9   :  { %985 = vmatpush.bf16.msra.mxu0 %v2010_v13  ;;  %961 = vmatpush.bf16.msra.mxu3 %v2007_v14 }
 0x1fa   :  { %v467_v20 = vmul.f32 %v465_v15, %v442_v48  ;;  %v470_v21 = vperm.slane %v465_v15, 0  ;;  %v2023_v48 = vld [vmem:[#allocation10 + $0xa8] sm:$0xff] }
 0x1fb   :  { %865 = vmatpush.bf16.msrb.mxu1 %v2023_v48 }
 0x1fc   :  { %v468_v22 = vsub.f32 %v466_v19, %v467_v20  ;;  %v474_v24 = vmul.f32 %v470_v21, %v396_v18  ;;  %v473_v25 = vmul.f32 %v470_v21, %v2395_v16  ;;  %v472_v26 = vmul.f32 %v470_v21, %v2397_v17  ;;  %v2006_v19 = vld [vmem:[#allocation10 + $0x20] sm:$0xff] }
 0x1fd   :  { %v475_v34 = vmul.f32 %v470_v21, %v397_v29  ;;  %962 = vmatpush.bf16.msra.mxu3 %v2006_v19 }
 0x1fe   :  { %v477_v23 = vperm.slane %v468_v22, 0  ;;  %v2005_v22 = vld [vmem:[#allocation10 + $0x18] sm:$0xff] }
 0x1ff   :  { %866 = vmatpush.bf16.msrb.mxu1 %v2022_v50 }
 0x200   :  { %v481_v27 = vadd.f32 %v477_v23, %v474_v24  ;;  %v480_v28 = vadd.f32 %v477_v23, %v473_v25  ;;  %v479_v30 = vadd.f32 %v477_v23, %v472_v26  ;;  %v482_v38 = vadd.f32 %v477_v23, %v475_v34  ;;  %v2004_v23 = vld [vmem:[#allocation10 + $0x10] sm:$0xff] }
 0x201   :  { %963 = vmatpush.bf16.msra.mxu3 %v2005_v22 }
 0x202   :  { %v485_v31 = vmax.f32 %v481_v27, 0.0  ;;  %v484_v32 = vmax.f32 %v480_v28, 0.0  ;;  %v483_v33 = vmax.f32 %v479_v30, 0.0  ;;  %v486_v16 = vmax.f32 %v482_v38, 0.0 }
 0x203   :  { %867 = vmatpush.bf16.msrb.mxu1 %v2021_v63 }
 0x204   :  { %v494_v35 = vrot.slane %v485_v31, 7  ;;  %v492_v36 = vrot.slane %v484_v32, 7  ;;  %v491_v37 = vrot.slane %v483_v33, 7  ;;  %v495_v18 = vrot.slane %v486_v16, 7  ;;  %v2003_v32 = vld [vmem:[#allocation10 + $0x8] sm:$0xff] }
 0x205   :  { %964 = vmatpush.bf16.msra.mxu3 %v2004_v23 }
 0x206   :  { %503 = vrot.lane.b32.xlu1 %v494_v35, %s2228_s23  ;;  %501 = vrot.lane.b32.xlu0 %v492_v36, %s2228_s23  ;;  %v493_v17 = vsel %vm420_vm4, %v491_v37, %v492_v36  ;;  %v496_v29 = vsel %vm420_vm4, %v494_v35, %v495_v18 }
 0x207   :  { %497 = vrot.lane.b32.xlu2 %v491_v37, %s2228_s23  ;;  %868 = vmatpush.bf16.msrb.mxu1 %v2020_v7 }
 0x209   :  { %965 = vmatpush.bf16.msra.mxu3 %v2003_v32 }
 0x20b   :  { %1024 = vmatpush.msra.mxu1 %v2347_v51 }
 0x20d   :  { %1025 = vmatpush.msra.mxu1 %v2350_v52 }
 0x20e   :  { %507 = vrot.lane.b32.xlu0 %v495_v18, %s2228_s23 }
 0x20f   :  { %499 = vrot.lane.b32.xlu2 %v493_v17, %s2228_s23  ;;  %1026 = vmatpush.msra.mxu1 %v2353_v53  ;;  %v2002_v17 = vld [vmem:[#allocation10] sm:$0xff] }
 0x210   :  { %966 = vmatpush.bf16.msra.mxu3 %v2002_v17 }
 0x211   :  { %1027 = vmatpush.msra.mxu1 %v2356_v54 }
 0x213   :  { %1028 = vmatpush.msra.mxu1 %v2359_v55 }
 0x215   :  { %1029 = vmatpush.msra.mxu1 %v2362_v56 }
 0x217   :  { %505 = vrot.lane.b32.xlu2 %v496_v29, %s2228_s23  ;;  %1030 = vmatpush.msra.mxu1 %v2365_v58 }
 0x219   :  { %1031 = vmatpush.msra.mxu1 %v2368_v60 }
 0x21b   :  { %1032 = vmatpush.msra.mxu1 %v2371_v61 }
 0x21d   :  { %1033 = vmatpush.msra.mxu1 %v2374_v62 }
 0x21f   :  { %1034 = vmatpush.msra.mxu1 %v2376_v1 }
 0x221   :  { %1035 = vmatpush.msra.mxu1 %v2379_v2 }
 0x223   :  { %1036 = vmatpush.msra.mxu1 %v2382_v4 }
 0x225   :  { %1037 = vmatpush.msra.mxu1 %v2385_v6 }
 0x227   :  { %1038 = vmatpush.msra.mxu1 %v2388_v8 }
 0x229   :  { %1039 = vmatpush.msra.mxu1 %v2391_v9 }
 0x261   :  { %v498_v3 = vpop.permute.xlu2 %497 }
 0x262   :  { %516 = vst.msk [vmem:[#allocation3] sm:$0xfe] %vm515_vm10, %v498_v3 }
 0x263   :  { %518 = vst.msk [vmem:[#allocation3 + $0x8] sm:$0xfe] %vm517_vm11, %v498_v3 }
 0x269   :  { %v500_v11 = vpop.permute.xlu2 %499  ;;  %v563_v24 = vld [vmem:[#allocation3] sm:$0xfe] }
 0x26a   :  { %520 = vst.msk [vmem:[#allocation3 + $0x10] sm:$0xff] %vm519_vm12, %v500_v11  ;;  %v564_v26 = vld [vmem:[#allocation3 + $0x8] sm:$0xfe]  ;;  %v733_v27 = vld [vmem:[#allocation3] sm:$0xfc]  ;;  %v584_v31 = vrot.slane %v563_v24, 1 }
 0x26b   :  { %522 = vst.msk [vmem:[#allocation3 + $0x18] sm:$0xff] %vm521_vm13, %v500_v11  ;;  %v734_v30 = vld [vmem:[#allocation3 + $0x8] sm:$0xfc]  ;;  %v587_v35 = vrot.slane %v564_v26, 1  ;;  %v750_v36 = vrot.slane %v733_v27, 2 }
 0x26c   :  { %v753_v16 = vrot.slane %v734_v30, 2 }
 0x271   :  { %v506_v15 = vpop.permute.xlu2 %505  ;;  %v2453_v25 = vld [vmem:[#allocation3 + $0x10] sm:$0xff] }
 0x272   :  { %529 = vst.msk [vmem:[#allocation3 + $0x40] sm:$0xff] %vm519_vm12, %v506_v15  ;;  %v2456_v28 = vld [vmem:[#allocation3 + $0x18] sm:$0xff]  ;;  %v585_v34 = vrot.slane %v2453_v25, 1  ;;  %v751_v37 = vrot.slane %v2453_v25, 2 }
 0x273   :  { %530 = vst.msk [vmem:[#allocation3 + $0x48] sm:$0xff] %vm521_vm13, %v506_v15  ;;  %v588_v38 = vrot.slane %v2456_v28, 1  ;;  %v754_v18 = vrot.slane %v2456_v28, 2 }
 0x274   :  { %v586_v44 = vsel %vm583_vm0, %v584_v31, %v585_v34  ;;  %v752_v46 = vsel %vm749_vm1, %v750_v36, %v751_v37 }
 0x275   :  { %v589_v49 = vsel %vm583_vm0, %v587_v35, %v588_v38  ;;  %v755_v57 = vsel %vm749_vm1, %v753_v16, %v754_v18 }
 0x278   :  { %v504_v20 = vpop.permute.xlu1 %503  ;;  %v502_v21 = vpop.permute.xlu0 %501 }
 0x279   :  { %527 = vst.msk [vmem:[#allocation3 + $0x30] sm:$0xfe] %vm515_vm10, %v504_v20  ;;  %v539_v12 = vld [vmem:[#allocation3 + $0x40] sm:$0xff] }
 0x27a   :  { %528 = vst.msk [vmem:[#allocation3 + $0x38] sm:$0xfe] %vm517_vm11, %v504_v20  ;;  %v540_v15 = vld [vmem:[#allocation3 + $0x48] sm:$0xff]  ;;  %v595_v30 = vrot.slane %v539_v12, 1  ;;  %v761_v32 = vrot.slane %v539_v12, 2 }
 0x27b   :  { %524 = vst.msk [vmem:[#allocation3 + $0x20] sm:$0x1] %vm523_vm14, %v502_v21  ;;  %v764_v36 = vrot.slane %v540_v15, 2 }
 0x27c   :  { %526 = vst.msk [vmem:[#allocation3 + $0x28] sm:$0x1] %vm525_vm15, %v502_v21 }
 0x280   :  { %v508_v33 = vpop.permute.xlu0 %507  ;;  %v567_v14 = vld [vmem:[#allocation3 + $0x30] sm:$0xfe] }
 0x281   :  { %531 = vst.msk [vmem:[#allocation3 + $0x50] sm:$0x1] %vm523_vm14, %v508_v33  ;;  %v737_v19 = vld [vmem:[#allocation3 + $0x30] sm:$0xfc]  ;;  %v568_v21 = vld [vmem:[#allocation3 + $0x38] sm:$0xfe] }
 0x282   :  { %532 = vst.msk [vmem:[#allocation3 + $0x58] sm:$0x1] %vm525_vm15, %v508_v33  ;;  %v565_v29 = vld [vmem:[#allocation3 + $0x20] sm:$0x1]  ;;  %v738_v23 = vld [vmem:[#allocation3 + $0x38] sm:$0xfc] }
 0x283   :  { %v735_v39 = vld [vmem:[#allocation3 + $0x20] sm:$0x3]  ;;  %v590_v40 = vrot.slane %v565_v29, 1  ;;  %v566_v41 = vld [vmem:[#allocation3 + $0x28] sm:$0x1]  ;;  %v594_v27 = vrot.slane %v567_v14, 1 }
 0x284   :  { %v756_v42 = vrot.slane %v735_v39, 2  ;;  %v736_v43 = vld [vmem:[#allocation3 + $0x28] sm:$0x3]  ;;  %v592_v45 = vrot.slane %v566_v41, 1  ;;  %v760_v31 = vrot.slane %v737_v19, 2  ;;  %v597_v33 = vrot.slane %v568_v21, 1 }
 0x285   :  { %v758_v47 = vrot.slane %v736_v43, 2  ;;  %v591_v48 = vsel %vm583_vm0, %v585_v34, %v590_v40  ;;  %v598_v34 = vrot.slane %v540_v15, 1  ;;  %v763_v35 = vrot.slane %v738_v23, 2 }
 0x286   :  { %v757_v50 = vsel %vm749_vm1, %v751_v37, %v756_v42  ;;  %v612_v59 = vpack.c.bf16 %v591_v48, %v586_v44  ;;  %v593_v63 = vsel %vm583_vm0, %v588_v38, %v592_v45  ;;  %v596_v17 = vsel %vm583_vm0, %v594_v27, %v595_v30  ;;  %v534_v45 = vld [vmem:[#allocation3 + $0x8] sm:$0xff] }
 0x287   :  { %v778_v3 = vpack.c.bf16 %v757_v50, %v752_v46  ;;  %v759_v5 = vsel %vm749_vm1, %v754_v18, %v758_v47  ;;  %v613_v7 = vpack.c.bf16 %v593_v63, %v589_v49  ;;  %v762_v29 = vsel %vm749_vm1, %v760_v31, %v761_v32  ;;  %v533_v46 = vld [vmem:[#allocation3] sm:$0xff]  ;;  %v538_v49 = vld [vmem:[#allocation3 + $0x38] sm:$0xff]  ;;  %v537_v50 = vld [vmem:[#allocation3 + $0x30] sm:$0xff] }
 0x288   :  { %v779_v10 = vpack.c.bf16 %v759_v5, %v755_v57  ;;  %703 = vmatmul.bf16.vlgmr.msrb.gmra.mxu0 %v612_v59  ;;  %v569_v0 = vld [vmem:[#allocation3 + $0x50] sm:$0x1]  ;;  %v599_v40 = vsel %vm583_vm0, %v597_v33, %v598_v34  ;;  %v765_v42 = vsel %vm749_vm1, %v763_v35, %v764_v36  ;;  %v542_v47 = vpack.c.bf16 %v2456_v28, %v534_v45 }
 0x289   :  { %869 = vmatmul.bf16.vlgmr.msrb.gmra.mxu1 %v778_v3  ;;  %1798 = vmatmul.msk.bf16.vlgmr.msrb.gmra.mxu3 %vm127_vm8, %v613_v7  ;;  %v739_v11 = vld [vmem:[#allocation3 + $0x50] sm:$0x3]  ;;  %v570_v13 = vld [vmem:[#allocation3 + $0x58] sm:$0x1]  ;;  %v600_v20 = vrot.slane %v569_v0, 1  ;;  %v541_v48 = vpack.c.bf16 %v2453_v25, %v533_v46  ;;  %v544_v57 = vpack.c.bf16 %v540_v15, %v538_v49  ;;  %v543_v59 = vpack.c.bf16 %v539_v12, %v537_v50 }
 0x28a   :  { %1836 = vmatmul.msk.bf16.vlgmr.msrb.gmra.mxu2 %vm127_vm8, %v779_v10  ;;  %v740_v9 = vld [vmem:[#allocation3 + $0x58] sm:$0x3]  ;;  %v766_v22 = vrot.slane %v739_v11, 2  ;;  %v602_v24 = vrot.slane %v570_v13, 1 }
 0x28b   :  { %v768_v26 = vrot.slane %v740_v9, 2  ;;  %v601_v37 = vsel %vm583_vm0, %v595_v30, %v600_v20 }
 0x28c   :  { %v767_v38 = vsel %vm749_vm1, %v761_v32, %v766_v22  ;;  %v603_v16 = vsel %vm583_vm0, %v598_v34, %v602_v24  ;;  %v614_v39 = vpack.c.bf16 %v601_v37, %v596_v17 }
 0x28d   :  { %v769_v18 = vsel %vm749_vm1, %v764_v36, %v768_v26  ;;  %v780_v41 = vpack.c.bf16 %v767_v38, %v762_v29  ;;  %v615_v43 = vpack.c.bf16 %v603_v16, %v599_v40 }
 0x28e   :  { %v781_v44 = vpack.c.bf16 %v769_v18, %v765_v42 }
 0x298   :  { %708 = vmatmul.bf16.gmra.mxu0 %v614_v39 }
 0x299   :  { %874 = vmatmul.bf16.gmra.mxu1 %v780_v41  ;;  %1799 = vmatmul.msk.bf16.gmra.mxu3 %vm127_vm8, %v615_v43 }
 0x29a   :  { %1837 = vmatmul.msk.bf16.gmra.mxu2 %vm127_vm8, %v781_v44 }
 0x2a8   :  { %1874 = vmatmul.msk.bf16.vlgmr.msra.gmra.mxu0 %vm127_vm8, %v542_v47 }
 0x2a9   :  { %967 = vmatmul.bf16.vlgmr.msra.gmra.mxu3 %v541_v48 }
 0x2b8   :  { %1875 = vmatmul.msk.bf16.gmra.mxu0 %vm127_vm8, %v544_v57 }
 0x2b9   :  { %972 = vmatmul.bf16.gmra.mxu3 %v543_v59 }
 0x305   :  { %v704_v63 = vpop.f32.mrf.mxu0 }
 0x306   :  { %v870_v25 = vpop.f32.mrf.mxu1 }
 0x30c   :  { %v723_v3 = vpop.f32.mrf.mxu3 }
 0x30d   :  { %v706_v5 = vpop.f32.mrf.mxu0  ;;  %v889_v13 = vpop.f32.mrf.mxu2  ;;  %v724_v22 = vadd.f32 %v723_v3, %v704_v63 }
 0x30e   :  { %v872_v20 = vpop.f32.mrf.mxu1  ;;  %v890_v38 = vadd.f32 %v889_v13, %v870_v25 }
 0x314   :  { %v725_v7 = vpop.f32.mrf.mxu3 }
 0x315   :  { %v709_v10 = vpop.f32.mrf.mxu0  ;;  %v891_v19 = vpop.f32.mrf.mxu2  ;;  %v726_v12 = vadd.f32 %v725_v7, %v706_v5 }
 0x316   :  { %v875_v26 = vpop.f32.mrf.mxu1  ;;  %v892_v35 = vadd.f32 %v891_v19, %v872_v20 }
 0x31c   :  { %v728_v0 = vpop.f32.mrf.mxu3 }
 0x31d   :  { %v711_v11 = vpop.f32.mrf.mxu0  ;;  %v894_v23 = vpop.f32.mrf.mxu2  ;;  %v729_v27 = vadd.f32 %v728_v0, %v709_v10 }
 0x31e   :  { %v895_v16 = vadd.f32 %v894_v23, %v875_v26  ;;  %v877_v42 = vpop.f32.mrf.mxu1 }
 0x324   :  { %v730_v28 = vpop.f32.mrf.mxu3 }
 0x325   :  { %v987_v9 = vpop.f32.mrf.mxu0  ;;  %v731_v17 = vadd.f32 %v730_v28, %v711_v11  ;;  %v896_v29 = vpop.f32.mrf.mxu2 }
 0x326   :  { %v897_v45 = vadd.f32 %v896_v29, %v877_v42 }
 0x32c   :  { %v968_v14 = vpop.f32.mrf.mxu3 }
 0x32d   :  { %v989_v21 = vpop.f32.mrf.mxu0  ;;  %v969_v30 = vadd.f32 %v968_v14, %v724_v22 }
 0x32f   :  { %v988_v36 = vadd.f32 %v987_v9, %v969_v30 }
 0x331   :  { %v997_v39 = vadd.f32 %v988_v36, %v890_v38 }
 0x333   :  { %v1010_v47 = vmul.f32 %v997_v39, %v997_v39 }
 0x334   :  { %v970_v15 = vpop.f32.mrf.mxu3 }
 0x335   :  { %v971_v24 = vadd.f32 %v970_v15, %v726_v12  ;;  %v992_v31 = vpop.f32.mrf.mxu0 }
 0x337   :  { %v990_v33 = vadd.f32 %v989_v21, %v971_v24 }
 0x339   :  { %v998_v18 = vadd.f32 %v990_v33, %v892_v35 }
 0x33b   :  { %v1011_v43 = vmul.f32 %v998_v18, %v998_v18  ;;  %v1001_v48 = vadd.f32 %v998_v18, %v997_v39 }
 0x33c   :  { %v973_v32 = vpop.f32.mrf.mxu3 }
 0x33d   :  { %v974_v34 = vadd.f32 %v973_v32, %v729_v27  ;;  %v994_v46 = vpop.f32.mrf.mxu0  ;;  %v1014_v57 = vadd.f32 %v1011_v43, %v1010_v47 }
 0x33f   :  { %v993_v37 = vadd.f32 %v992_v31, %v974_v34 }
 0x341   :  { %v2492_v40 = vadd.f32 %v993_v37, %v895_v16  ;;  %v1050_v16 = vld [vmem:[%s2597_s6] sm:$0x1] }
 0x343   :  { %v1012_v49 = vmul.f32 %v2492_v40, %v2492_v40  ;;  %v1002_v59 = vadd.f32 %v1001_v48, %v2492_v40 }
 0x344   :  { %v975_v41 = vpop.f32.mrf.mxu3 }
 0x345   :  { %v976_v44 = vadd.f32 %v975_v41, %v731_v17  ;;  %v1015_v3 = vadd.f32 %v1014_v57, %v1012_v49  ;;  %v1068_v41 = vld [vmem:[%s2598_s7] sm:$0x1] }
 0x347   :  { %v995_v50 = vadd.f32 %v994_v46, %v976_v44 }
 0x349   :  { %v1000_v63 = vadd.f32 %v995_v50, %v897_v45 }
 0x34b   :  { %v1003_v5 = vadd.f32 %v1002_v59, %v1000_v63  ;;  %v1013_v7 = vmul.f32 %v1000_v63, %v1000_v63 }
 0x34d   :  { %v1004_v10 = vrot.slane %v1003_v5, 4  ;;  %v1016_v0 = vadd.f32 %v1015_v3, %v1013_v7 }
 0x34f   :  { %v1005_v11 = vadd.f32 %v1004_v10, %v1003_v5  ;;  %v1017_v28 = vrot.slane %v1016_v0, 4 }
 0x351   :  { %v1006_v13 = vrot.slane %v1005_v11, 2  ;;  %v1018_v25 = vadd.f32 %v1017_v28, %v1016_v0 }
 0x353   :  { %v1007_v9 = vadd.f32 %v1006_v13, %v1005_v11  ;;  %v1019_v14 = vrot.slane %v1018_v25, 2  ;;  %v2045_v13 = vld [vmem:[#allocation12 + $0x80] sm:$0xff] }
 0x354   :  { %1290 = vmatpush.bf16.msra.mxu2 %v2045_v13 }
 0x355   :  { %v1008_v19 = vrot.slane %v1007_v9, 1  ;;  %v1020_v20 = vadd.f32 %v1019_v14, %v1018_v25  ;;  %v2054_v25 = vld [vmem:[#allocation12 + $0xc8] sm:$0xff]  ;;  %v2053_v14 = vld [vmem:[#allocation12 + $0xc0] sm:$0xff] }
 0x356   :  { %1455 = vmatpush.bf16.msrb.mxu3 %v2054_v25 }
 0x357   :  { %v1021_v21 = vrot.slane %v1020_v20, 1  ;;  %v1009_v15 = vadd.f32 %v1008_v19, %v1007_v9  ;;  %v2044_v9 = vld [vmem:[#allocation12 + $0x78] sm:$0xff]  ;;  %v2043_v19 = vld [vmem:[#allocation12 + $0x70] sm:$0xff] }
 0x358   :  { %1291 = vmatpush.bf16.msra.mxu2 %v2044_v9 }
 0x359   :  { %v1022_v12 = vadd.f32 %v1021_v21, %v1020_v20  ;;  %v2052_v20 = vld [vmem:[#allocation12 + $0xb8] sm:$0xff]  ;;  %v2042_v21 = vld [vmem:[#allocation12 + $0x68] sm:$0xff] }
 0x35a   :  { %1456 = vmatpush.bf16.msrb.mxu3 %v2053_v14 }
 0x35b   :  { %v1023_v22 = vsel %vm420_vm4, %v1009_v15, %v1022_v12  ;;  %v2051_v15 = vld [vmem:[#allocation12 + $0xb0] sm:$0xff]  ;;  %v2041_v12 = vld [vmem:[#allocation12 + $0x60] sm:$0xff] }
 0x35c   :  { %1040 = vmatmul.f32.vlgmr.msra.gmra.mxu1 %v1023_v22  ;;  %1292 = vmatpush.bf16.msra.mxu2 %v2043_v19  ;;  %v2050_v22 = vld [vmem:[#allocation12 + $0xa8] sm:$0xff] }
 0x35e   :  { %1457 = vmatpush.bf16.msrb.mxu3 %v2052_v20 }
 0x360   :  { %1293 = vmatpush.bf16.msra.mxu2 %v2042_v21 }
 0x362   :  { %1458 = vmatpush.bf16.msrb.mxu3 %v2051_v15 }
 0x364   :  { %1294 = vmatpush.bf16.msra.mxu2 %v2041_v12 }
 0x366   :  { %1459 = vmatpush.bf16.msrb.mxu3 %v2050_v22 }
 0x3d9   :  { %v1041_v23 = vpop.f32.mrf.mxu1 }
 0x3da   :  { %v1044_v24 = vmul.f32 0.001953125, %v1041_v23  ;;  %v2040_v23 = vld [vmem:[#allocation12 + $0x58] sm:$0xff] }
 0x3db   :  { %1295 = vmatpush.bf16.msra.mxu2 %v2040_v23 }
 0x3dc   :  { %v1045_v26 = vmul.f32 %v1044_v24, %v1044_v24 }
 0x3de   :  { %v1047_v27 = vrot.slane %v1045_v26, 7  ;;  %v2039_v26 = vld [vmem:[#allocation12 + $0x50] sm:$0xff] }
 0x3df   :  { %1296 = vmatpush.bf16.msra.mxu2 %v2039_v26 }
 0x3e0   :  { %v1049_v30 = vsub.f32 %v1044_v24, %v1047_v27  ;;  %v2048_v27 = vld [vmem:[#allocation12 + $0x98] sm:$0xff] }
 0x3e2   :  { %v1051_v31 = vadd.f32 1e-05, %v1049_v30 }
 0x3e4   :  { %2069 = vrsqrt.f32 %v1051_v31  ;;  %vm1058_vm3 = vweird.f32 %v1051_v31 }
 0x3ea   :  { %v2070_v32 = vpop.eup %2069 }
 0x3eb   :  { %v1053_v33 = vmul.f32 %v2070_v32, %v1051_v31  ;;  %vm1059_vm2 = vweird.f32 %v2070_v32  ;;  %v2038_v31 = vld [vmem:[#allocation12 + $0x48] sm:$0xff] }
 0x3ec   :  { %vm1060_vm5 = vmor %vm1058_vm3, %vm1059_vm2  ;;  %1297 = vmatpush.bf16.msra.mxu2 %v2038_v31 }
 0x3ed   :  { %v1054_v34 = vmul.f32 %v2070_v32, %v1053_v33  ;;  %v2047_v33 = vld [vmem:[#allocation12 + $0x90] sm:$0xff] }
 0x3ef   :  { %v1055_v35 = vmul.f32 0.5, %v1054_v34  ;;  %v2055_v34 = vld [vmem:[#allocation12 + $0xd0] sm:$0xff] }
 0x3f0   :  { %1481 = vmatpush.bf16.msrb.mxu0 %v2055_v34 }
 0x3f1   :  { %v1056_v36 = vsub.f32 1.5, %v1055_v35 }
 0x3f3   :  { %v1057_v37 = vmul.f32 %v2070_v32, %v1056_v36  ;;  %v2036_v36 = vld [vmem:[#allocation12 + $0x38] sm:$0xff] }
 0x3f4   :  { %1553 = vmatpush.bf16.msrb.mxu2 %v2036_v36 }
 0x3f5   :  { %v1061_v38 = vsel %vm1060_vm5, %v2070_v32, %v1057_v37  ;;  %v2046_v32 = vld [vmem:[#allocation12 + $0x88] sm:$0xff]  ;;  %v2037_v37 = vld [vmem:[#allocation12 + $0x40] sm:$0xff] }
 0x3f6   :  { %1063 = vst [vmem:[#allocation1] sm:$0xff] %v1061_v38  ;;  %1316 = vmatpush.bf16.msrb.mxu1 %v2046_v32  ;;  %v2035_v38 = vld [vmem:[#allocation12 + $0x30] sm:$0xff] }
 0x3f8   :  { %1554 = vmatpush.bf16.msrb.mxu2 %v2035_v38 }
 0x3fa   :  { %1579 = vmatpush.bf16.msra.mxu1 %v2037_v37 }
 0x3fd   :  { %v1065_v17 = vld [vmem:[#allocation1 + $0x1] ss:$9 sm:$0xff] }
 0x3fe   :  { %v1067_v29 = vmul.f32 %v1065_v17, %v1050_v16  ;;  %v2034_v16 = vld [vmem:[#allocation12 + $0x28] sm:$0xff] }
 0x3ff   :  { %1555 = vmatpush.bf16.msrb.mxu2 %v2034_v16 }
 0x400   :  { %v1069_v42 = vmul.f32 %v1067_v29, %v1044_v24  ;;  %v1072_v43 = vperm.slane %v1067_v29, 0  ;;  %v2049_v24 = vld [vmem:[#allocation12 + $0xa0] sm:$0xff] }
 0x401   :  { %1460 = vmatpush.bf16.msrb.mxu3 %v2049_v24 }
 0x402   :  { %v1070_v44 = vsub.f32 %v1068_v41, %v1069_v42  ;;  %v1075_v46 = vmul.f32 %v1072_v43, %v998_v18  ;;  %v1074_v47 = vmul.f32 %v1072_v43, %v997_v39  ;;  %v1077_v50 = vmul.f32 %v1072_v43, %v1000_v63  ;;  %v2030_v41 = vld [vmem:[#allocation12 + $0x8] sm:$0xff] }
 0x403   :  { %v1076_v57 = vmul.f32 %v1072_v43, %v2492_v40 }
 0x404   :  { %v1079_v45 = vperm.slane %v1070_v44, 0 }
 0x405   :  { %1461 = vmatpush.bf16.msrb.mxu3 %v2048_v27 }
 0x406   :  { %v1082_v48 = vadd.f32 %v1079_v45, %v1075_v46  ;;  %v1081_v49 = vadd.f32 %v1079_v45, %v1074_v47  ;;  %v1084_v5 = vadd.f32 %v1079_v45, %v1077_v50  ;;  %v1083_v7 = vadd.f32 %v1079_v45, %v1076_v57 }
 0x408   :  { %v1086_v59 = vmax.f32 %v1082_v48, 0.0  ;;  %v1085_v3 = vmax.f32 %v1081_v49, 0.0  ;;  %v1088_v28 = vmax.f32 %v1084_v5, 0.0  ;;  %v1087_v18 = vmax.f32 %v1083_v7, 0.0 }
 0x409   :  { %1462 = vmatpush.bf16.msrb.mxu3 %v2047_v33 }
 0x40a   :  { %v1094_v10 = vrot.slane %v1086_v59, 7  ;;  %v1093_v0 = vrot.slane %v1085_v3, 7  ;;  %v1097_v39 = vrot.slane %v1088_v28, 7  ;;  %v1096_v63 = vrot.slane %v1087_v18, 7 }
 0x40c   :  { %1103 = vrot.lane.b32.xlu0 %v1094_v10, %s2228_s23  ;;  %1099 = vrot.lane.b32.xlu1 %v1093_v0, %s2228_s23  ;;  %v1095_v11 = vsel %vm420_vm4, %v1093_v0, %v1094_v10  ;;  %v1098_v40 = vsel %vm420_vm4, %v1096_v63, %v1097_v39  ;;  %v2029_v0 = vld [vmem:[#allocation12] sm:$0xff] }
 0x40d   :  { %1101 = vrot.lane.b32.xlu2 %v1095_v11, %s2228_s23  ;;  %1618 = vmatpush.msra.mxu3 %v2347_v51  ;;  %v2033_v51 = vld [vmem:[#allocation12 + $0x20] sm:$0xff] }
 0x40e   :  { %1556 = vmatpush.bf16.msrb.mxu2 %v2033_v51 }
 0x40f   :  { %1619 = vmatpush.msra.mxu3 %v2350_v52 }
 0x411   :  { %1620 = vmatpush.msra.mxu3 %v2353_v53  ;;  %v2032_v53 = vld [vmem:[#allocation12 + $0x18] sm:$0xff] }
 0x412   :  { %1557 = vmatpush.bf16.msrb.mxu2 %v2032_v53 }
 0x413   :  { %1621 = vmatpush.msra.mxu3 %v2356_v54  ;;  %v2031_v54 = vld [vmem:[#allocation12 + $0x10] sm:$0xff] }
 0x414   :  { %1109 = vrot.lane.b32.xlu0 %v1097_v39, %s2228_s23  ;;  %1105 = vrot.lane.b32.xlu1 %v1096_v63, %s2228_s23  ;;  %v2073_v63 = vld [vmem:[#allocation7] sm:$0xff] }
 0x415   :  { %1107 = vrot.lane.b32.xlu2 %v1098_v40, %s2228_s23  ;;  %1622 = vmatpush.msra.mxu3 %v2359_v55 }
 0x416   :  { %1558 = vmatpush.bf16.msrb.mxu2 %v2031_v54 }
 0x417   :  { %1623 = vmatpush.msra.mxu3 %v2362_v56 }
 0x419   :  { %1624 = vmatpush.msra.mxu3 %v2365_v58 }
 0x41a   :  { %1559 = vmatpush.bf16.msrb.mxu2 %v2030_v41 }
 0x41b   :  { %1625 = vmatpush.msra.mxu3 %v2368_v60 }
 0x41d   :  { %1626 = vmatpush.msra.mxu3 %v2371_v61 }
 0x41e   :  { %1560 = vmatpush.bf16.msrb.mxu2 %v2029_v0 }
 0x41f   :  { %1627 = vmatpush.msra.mxu3 %v2374_v62 }
 0x421   :  { %1628 = vmatpush.msra.mxu3 %v2376_v1 }
 0x423   :  { %1629 = vmatpush.msra.mxu3 %v2379_v2 }
 0x425   :  { %1630 = vmatpush.msra.mxu3 %v2382_v4 }
 0x427   :  { %1631 = vmatpush.msra.mxu3 %v2385_v6 }
 0x429   :  { %1632 = vmatpush.msra.mxu3 %v2388_v8 }
 0x42b   :  { %1633 = vmatpush.msra.mxu3 %v2073_v63 }
 0x467   :  { %v1102_v30 = vpop.permute.xlu2 %1101 }
 0x468   :  { %1119 = vst.msk [vmem:[#allocation3 + $0x10] sm:$0xff] %vm519_vm12, %v1102_v30 }
 0x469   :  { %1120 = vst.msk [vmem:[#allocation3 + $0x18] sm:$0xff] %vm521_vm13, %v1102_v30 }
 0x46f   :  { %v1108_v35 = vpop.permute.xlu2 %1107  ;;  %v2532_v55 = vld [vmem:[#allocation3 + $0x10] sm:$0xff] }
 0x470   :  { %1125 = vst.msk [vmem:[#allocation3 + $0x40] sm:$0xff] %vm519_vm12, %v1108_v35  ;;  %v2535_v56 = vld [vmem:[#allocation3 + $0x18] sm:$0xff]  ;;  %v1180_v29 = vrot.slane %v2532_v55, 1  ;;  %v1345_v4 = vrot.slane %v2532_v55, 2 }
 0x471   :  { %1126 = vst.msk [vmem:[#allocation3 + $0x48] sm:$0xff] %vm521_vm13, %v1108_v35  ;;  %v1183_v44 = vrot.slane %v2535_v56, 1  ;;  %v1348_v59 = vrot.slane %v2535_v56, 2 }
 0x477   :  { %v1135_v21 = vld [vmem:[#allocation3 + $0x40] sm:$0xff] }
 0x478   :  { %v1136_v22 = vld [vmem:[#allocation3 + $0x48] sm:$0xff]  ;;  %v1190_v34 = vrot.slane %v1135_v21, 1 }
 0x479   :  { %v1193_v37 = vrot.slane %v1136_v22, 1 }
 0x47e   :  { %v1104_v52 = vpop.permute.xlu0 %1103  ;;  %v1100_v17 = vpop.permute.xlu1 %1099 }
 0x47f   :  { %1121 = vst.msk [vmem:[#allocation3 + $0x20] sm:$0x1] %vm523_vm14, %v1104_v52 }
 0x480   :  { %1122 = vst.msk [vmem:[#allocation3 + $0x28] sm:$0x1] %vm525_vm15, %v1104_v52 }
 0x481   :  { %1117 = vst.msk [vmem:[#allocation3] sm:$0xfe] %vm515_vm10, %v1100_v17 }
 0x482   :  { %1118 = vst.msk [vmem:[#allocation3 + $0x8] sm:$0xfe] %vm517_vm11, %v1100_v17  ;;  %v1355_v17 = vrot.slane %v1135_v21, 2 }
 0x486   :  { %v1110_v58 = vpop.permute.xlu0 %1109  ;;  %v1106_v60 = vpop.permute.xlu1 %1105  ;;  %v1161_v61 = vld [vmem:[#allocation3 + $0x20] sm:$0x1] }
 0x487   :  { %v1330_v62 = vld [vmem:[#allocation3 + $0x20] sm:$0x3]  ;;  %1127 = vst.msk [vmem:[#allocation3 + $0x50] sm:$0x1] %vm523_vm14, %v1110_v58  ;;  %v1185_v42 = vrot.slane %v1161_v61, 1 }
 0x488   :  { %v1162_v1 = vld [vmem:[#allocation3 + $0x28] sm:$0x1]  ;;  %v1350_v43 = vrot.slane %v1330_v62, 2  ;;  %1128 = vst.msk [vmem:[#allocation3 + $0x58] sm:$0x1] %vm525_vm15, %v1110_v58  ;;  %v1358_v58 = vrot.slane %v1136_v22, 2 }
 0x489   :  { %v1159_v2 = vld [vmem:[#allocation3] sm:$0xfe]  ;;  %v1187_v45 = vrot.slane %v1162_v1, 1  ;;  %1123 = vst.msk [vmem:[#allocation3 + $0x30] sm:$0xfe] %vm515_vm10, %v1106_v60  ;;  %v1186_v47 = vsel %vm583_vm0, %v1180_v29, %v1185_v42 }
 0x48a   :  { %v1179_v46 = vrot.slane %v1159_v2, 1  ;;  %v1160_v48 = vld [vmem:[#allocation3 + $0x8] sm:$0xfe]  ;;  %1124 = vst.msk [vmem:[#allocation3 + $0x38] sm:$0xfe] %vm517_vm11, %v1106_v60  ;;  %v1351_v5 = vsel %vm749_vm1, %v1345_v4, %v1350_v43  ;;  %v1129_v2 = vld [vmem:[#allocation3] sm:$0xff] }
 0x48b   :  { %v1182_v49 = vrot.slane %v1160_v48, 1  ;;  %v1188_v50 = vsel %vm583_vm0, %v1183_v44, %v1187_v45  ;;  %v1328_v57 = vld [vmem:[#allocation3] sm:$0xfc]  ;;  %v1329_v7 = vld [vmem:[#allocation3 + $0x8] sm:$0xfc]  ;;  %v1137_v45 = vpack.c.bf16 %v2532_v55, %v1129_v2 }
 0x48c   :  { %v1181_v6 = vsel %vm583_vm0, %v1179_v46, %v1180_v29  ;;  %v1344_v3 = vrot.slane %v1328_v57, 2  ;;  %v1331_v10 = vld [vmem:[#allocation3 + $0x28] sm:$0x3]  ;;  %v1347_v18 = vrot.slane %v1329_v7, 2 }
 0x48d   :  { %v1207_v11 = vpack.c.bf16 %v1186_v47, %v1181_v6  ;;  %v1184_v28 = vsel %vm583_vm0, %v1182_v49, %v1183_v44  ;;  %v1352_v39 = vrot.slane %v1331_v10, 2  ;;  %v1130_v44 = vld [vmem:[#allocation3 + $0x8] sm:$0xff] }
 0x48e   :  { %v1208_v40 = vpack.c.bf16 %v1188_v50, %v1184_v28  ;;  %v1346_v13 = vsel %vm749_vm1, %v1344_v3, %v1345_v4  ;;  %v1349_v25 = vsel %vm749_vm1, %v1347_v18, %v1348_v59  ;;  %v1165_v20 = vld [vmem:[#allocation3 + $0x50] sm:$0x1]  ;;  %v1138_v46 = vpack.c.bf16 %v2535_v56, %v1130_v44 }
 0x48f   :  { %1298 = vmatmul.bf16.vlgmr.msra.gmra.mxu2 %v1207_v11  ;;  %v1372_v8 = vpack.c.bf16 %v1351_v5, %v1346_v13  ;;  %v1353_v9 = vsel %vm749_vm1, %v1348_v59, %v1352_v39  ;;  %v1166_v12 = vld [vmem:[#allocation3 + $0x58] sm:$0x1]  ;;  %v1334_v24 = vld [vmem:[#allocation3 + $0x50] sm:$0x3]  ;;  %v1195_v27 = vrot.slane %v1165_v20, 1 }
 0x490   :  { %1912 = vmatmul.msk.bf16.vlgmr.msrb.gmra.mxu1 %vm127_vm8, %v1208_v40  ;;  %v1373_v14 = vpack.c.bf16 %v1353_v9, %v1349_v25  ;;  %v1163_v19 = vld [vmem:[#allocation3 + $0x30] sm:$0xfe]  ;;  %v1335_v31 = vld [vmem:[#allocation3 + $0x58] sm:$0x3]  ;;  %v1197_v33 = vrot.slane %v1166_v12, 1  ;;  %v1360_v36 = vrot.slane %v1334_v24, 2 }
 0x491   :  { %1463 = vmatmul.bf16.vlgmr.msrb.gmra.mxu3 %v1372_v8  ;;  %v1164_v15 = vld [vmem:[#allocation3 + $0x38] sm:$0xfe]  ;;  %v1332_v23 = vld [vmem:[#allocation3 + $0x30] sm:$0xfc]  ;;  %v1189_v26 = vrot.slane %v1163_v19, 1  ;;  %v1362_v16 = vrot.slane %v1335_v31, 2  ;;  %v1196_v52 = vsel %vm583_vm0, %v1190_v34, %v1195_v27 }
 0x492   :  { %1950 = vmatmul.msk.bf16.vlgmr.msrb.gmra.mxu0 %vm127_vm8, %v1373_v14  ;;  %v1333_v30 = vld [vmem:[#allocation3 + $0x38] sm:$0xfc]  ;;  %v1192_v32 = vrot.slane %v1164_v15, 1  ;;  %v1354_v35 = vrot.slane %v1332_v23, 2  ;;  %v1198_v54 = vsel %vm583_vm0, %v1193_v37, %v1197_v33  ;;  %v1361_v61 = vsel %vm749_vm1, %v1355_v17, %v1360_v36  ;;  %v1133_v47 = vld [vmem:[#allocation3 + $0x30] sm:$0xff] }
 0x493   :  { %v1357_v38 = vrot.slane %v1333_v30, 2  ;;  %v1191_v51 = vsel %vm583_vm0, %v1189_v26, %v1190_v34  ;;  %v1363_v41 = vsel %vm749_vm1, %v1358_v58, %v1362_v16  ;;  %v1134_v48 = vld [vmem:[#allocation3 + $0x38] sm:$0xff]  ;;  %v1139_v4 = vpack.c.bf16 %v1135_v21, %v1133_v47 }
 0x494   :  { %v1194_v53 = vsel %vm583_vm0, %v1192_v32, %v1193_v37  ;;  %v1356_v60 = vsel %vm749_vm1, %v1354_v35, %v1355_v17  ;;  %v1209_v29 = vpack.c.bf16 %v1196_v52, %v1191_v51  ;;  %v1140_v49 = vpack.c.bf16 %v1136_v22, %v1134_v48 }
 0x495   :  { %v1359_v62 = vsel %vm749_vm1, %v1357_v38, %v1358_v58  ;;  %v1210_v42 = vpack.c.bf16 %v1198_v54, %v1194_v53  ;;  %v1374_v1 = vpack.c.bf16 %v1361_v61, %v1356_v60 }
 0x496   :  { %v1375_v43 = vpack.c.bf16 %v1363_v41, %v1359_v62 }
 0x49f   :  { %1303 = vmatmul.bf16.gmra.mxu2 %v1209_v29 }
 0x4a0   :  { %1913 = vmatmul.msk.bf16.gmra.mxu1 %vm127_vm8, %v1210_v42 }
 0x4a1   :  { %1468 = vmatmul.bf16.gmra.mxu3 %v1374_v1 }
 0x4a2   :  { %1951 = vmatmul.msk.bf16.gmra.mxu0 %vm127_vm8, %v1375_v43 }
 0x4af   :  { %1561 = vmatmul.bf16.vlgmr.msrb.gmra.mxu2 %v1137_v45 }
 0x4b0   :  { %1988 = vmatmul.msk.bf16.vlgmr.msra.gmra.mxu1 %vm127_vm8, %v1138_v46 }
 0x4bf   :  { %1566 = vmatmul.bf16.gmra.mxu2 %v1139_v4 }
 0x4c0   :  { %1989 = vmatmul.msk.bf16.gmra.mxu1 %vm127_vm8, %v1140_v49 }
 0x50d   :  { %v1318_v50 = vpop.f32.mrf.mxu1 }
 0x50f   :  { %v1483_v56 = vpop.f32.mrf.mxu0 }
 0x512   :  { %v1299_v57 = vpop.f32.mrf.mxu2 }
 0x513   :  { %v1319_v13 = vadd.f32 %v1318_v50, %v1299_v57 }
 0x514   :  { %v1464_v10 = vpop.f32.mrf.mxu3 }
 0x515   :  { %v1320_v59 = vpop.f32.mrf.mxu1  ;;  %v1484_v26 = vadd.f32 %v1483_v56, %v1464_v10 }
 0x517   :  { %v1485_v18 = vpop.f32.mrf.mxu0 }
 0x51a   :  { %v1301_v6 = vpop.f32.mrf.mxu2 }
 0x51b   :  { %v1321_v40 = vadd.f32 %v1320_v59, %v1301_v6 }
 0x51c   :  { %v1466_v28 = vpop.f32.mrf.mxu3 }
 0x51d   :  { %v1323_v3 = vpop.f32.mrf.mxu1  ;;  %v1486_v22 = vadd.f32 %v1485_v18, %v1466_v28 }
 0x51f   :  { %v1488_v9 = vpop.f32.mrf.mxu0 }
 0x522   :  { %v1304_v5 = vpop.f32.mrf.mxu2 }
 0x523   :  { %v1324_v14 = vadd.f32 %v1323_v3, %v1304_v5 }
 0x524   :  { %v1469_v8 = vpop.f32.mrf.mxu3 }
 0x525   :  { %v1325_v7 = vpop.f32.mrf.mxu1  ;;  %v1489_v27 = vadd.f32 %v1488_v9, %v1469_v8 }
 0x527   :  { %v1490_v36 = vpop.f32.mrf.mxu0 }
 0x52a   :  { %v1306_v55 = vpop.f32.mrf.mxu2 }
 0x52b   :  { %v1326_v31 = vadd.f32 %v1325_v7, %v1306_v55 }
 0x52c   :  { %v1471_v32 = vpop.f32.mrf.mxu3 }
 0x52d   :  { %v1581_v0 = vpop.f32.mrf.mxu1  ;;  %v1491_v16 = vadd.f32 %v1490_v36, %v1471_v32 }
 0x532   :  { %v1562_v11 = vpop.f32.mrf.mxu2 }
 0x533   :  { %v1563_v19 = vadd.f32 %v1562_v11, %v1319_v13 }
 0x535   :  { %v1583_v39 = vpop.f32.mrf.mxu1  ;;  %v1582_v23 = vadd.f32 %v1581_v0, %v1563_v19 }
 0x537   :  { %v1591_v33 = vadd.f32 %v1582_v23, %v1484_v26 }
 0x539   :  { %v1604_v52 = vmul.f32 %v1591_v33, %v1591_v33 }
 0x53a   :  { %v1564_v63 = vpop.f32.mrf.mxu2 }
 0x53b   :  { %v1565_v25 = vadd.f32 %v1564_v63, %v1321_v40  ;;  %v1644_v40 = vld [vmem:[%s2600_s9] sm:$0x1]  ;;  %s2236_s9 = smov [#allocation13]  }
 0x53c   :  { %s1691_s12 = sshll.u32 %s2236_s9, 4  ;;  %s1692_s12 = int_to_ptr.vmem [resolvable:$true] %s1691_s12 }
 0x53d   :  { %v1586_v20 = vpop.f32.mrf.mxu1  ;;  %v1584_v15 = vadd.f32 %v1583_v39, %v1565_v25  ;;  %v1662_v25 = vld [vmem:[%s2601_s10] sm:$0x1] }
 0x53f   :  { %v2572_v30 = vadd.f32 %v1584_v15, %v1486_v22 }
 0x541   :  { %v1605_v37 = vmul.f32 %v2572_v30, %v2572_v30  ;;  %v1595_v17 = vadd.f32 %v2572_v30, %v1591_v33 }
 0x542   :  { %v1567_v21 = vpop.f32.mrf.mxu2 }
 0x543   :  { %v1568_v12 = vadd.f32 %v1567_v21, %v1324_v14  ;;  %v1608_v58 = vadd.f32 %v1605_v37, %v1604_v52 }
 0x545   :  { %v1587_v24 = vadd.f32 %v1586_v20, %v1568_v12  ;;  %v1588_v51 = vpop.f32.mrf.mxu1 }
 0x547   :  { %v1593_v34 = vadd.f32 %v1587_v24, %v1489_v27 }
 0x549   :  { %v1606_v53 = vmul.f32 %v1593_v34, %v1593_v34  ;;  %v1596_v60 = vadd.f32 %v1595_v17, %v1593_v34 }
 0x54a   :  { %v1569_v35 = vpop.f32.mrf.mxu2 }
 0x54b   :  { %v1570_v38 = vadd.f32 %v1569_v35, %v1326_v31  ;;  %v1609_v29 = vadd.f32 %v1608_v58, %v1606_v53 }
 0x54d   :  { %v1589_v54 = vadd.f32 %v1588_v51, %v1570_v38 }
 0x54f   :  { %v1594_v61 = vadd.f32 %v1589_v54, %v1491_v16 }
 0x551   :  { %v1597_v62 = vadd.f32 %v1596_v60, %v1594_v61  ;;  %v1607_v41 = vmul.f32 %v1594_v61, %v1594_v61 }
 0x553   :  { %v1598_v42 = vrot.slane %v1597_v62, 4  ;;  %v1610_v1 = vadd.f32 %v1609_v29, %v1607_v41 }
 0x555   :  { %v1599_v43 = vadd.f32 %v1598_v42, %v1597_v62  ;;  %v1611_v2 = vrot.slane %v1610_v1, 4 }
 0x557   :  { %v1600_v44 = vrot.slane %v1599_v43, 2  ;;  %v1612_v45 = vadd.f32 %v1611_v2, %v1610_v1 }
 0x559   :  { %v1601_v46 = vadd.f32 %v1600_v44, %v1599_v43  ;;  %v1613_v47 = vrot.slane %v1612_v45, 2 }
 0x55b   :  { %v1602_v48 = vrot.slane %v1601_v46, 1  ;;  %v1614_v4 = vadd.f32 %v1613_v47, %v1612_v45 }
 0x55d   :  { %v1615_v49 = vrot.slane %v1614_v4, 1  ;;  %v1603_v50 = vadd.f32 %v1602_v48, %v1601_v46 }
 0x55f   :  { %v1616_v57 = vadd.f32 %v1615_v49, %v1614_v4 }
 0x561   :  { %v1617_v59 = vsel %vm420_vm4, %v1603_v50, %v1616_v57 }
 0x562   :  { %1634 = vmatmul.f32.vlgmr.msra.gmra.mxu3 %v1617_v59 }
 0x5e5   :  { %v1635_v6 = vpop.f32.mrf.mxu3 }
 0x5e6   :  { %v1638_v3 = vmul.f32 0.001953125, %v1635_v6 }
 0x5e8   :  { %v1639_v5 = vmul.f32 %v1638_v3, %v1638_v3 }
 0x5ea   :  { %v1641_v7 = vrot.slane %v1639_v5, 7 }
 0x5ec   :  { %v1643_v55 = vsub.f32 %v1638_v3, %v1641_v7 }
 0x5ee   :  { %v1645_v10 = vadd.f32 1e-05, %v1643_v55 }
 0x5f0   :  { %2071 = vrsqrt.f32 %v1645_v10  ;;  %vm1652_vm7 = vweird.f32 %v1645_v10 }
 0x5f6   :  { %v2072_v56 = vpop.eup %2071 }
 0x5f7   :  { %v1647_v0 = vmul.f32 %v2072_v56, %v1645_v10  ;;  %vm1653_vm6 = vweird.f32 %v2072_v56 }
 0x5f8   :  { %vm1654_vm8 = vmor %vm1652_vm7, %vm1653_vm6 }
 0x5f9   :  { %v1648_v11 = vmul.f32 %v2072_v56, %v1647_v0 }
 0x5fb   :  { %v1649_v28 = vmul.f32 0.5, %v1648_v11 }
 0x5fd   :  { %v1650_v18 = vsub.f32 1.5, %v1649_v28 }
 0x5ff   :  { %v1651_v39 = vmul.f32 %v2072_v56, %v1650_v18 }
 0x601   :  { %v1655_v63 = vsel %vm1654_vm8, %v2072_v56, %v1651_v39 }
 0x602   :  { %1657 = vst [vmem:[#allocation1] sm:$0xff] %v1655_v63 }
 0x609   :  { %v1659_v13 = vld [vmem:[#allocation1 + $0x1] ss:$9 sm:$0xff] }
 0x60a   :  { %v1661_v8 = vmul.f32 %v1659_v13, %v1644_v40 }
 0x60c   :  { %v1663_v9 = vmul.f32 %v1661_v8, %v1638_v3  ;;  %v1666_v14 = vperm.slane %v1661_v8, 0 }
 0x60e   :  { %v1664_v19 = vsub.f32 %v1662_v25, %v1663_v9  ;;  %v1668_v20 = vmul.f32 %v1666_v14, %v1591_v33  ;;  %v1669_v15 = vmul.f32 %v1666_v14, %v2572_v30  ;;  %v1670_v12 = vmul.f32 %v1666_v14, %v1593_v34 }
 0x60f   :  { %v1671_v22 = vmul.f32 %v1666_v14, %v1594_v61 }
 0x610   :  { %v1673_v21 = vperm.slane %v1664_v19, 0 }
 0x612   :  { %v1675_v23 = vadd.f32 %v1673_v21, %v1668_v20  ;;  %v1676_v24 = vadd.f32 %v1673_v21, %v1669_v15  ;;  %v1677_v26 = vadd.f32 %v1673_v21, %v1670_v12  ;;  %v1678_v27 = vadd.f32 %v1673_v21, %v1671_v22 }
 0x614   :  { %v1679_v31 = vmax.f32 %v1675_v23, 0.0  ;;  %v1680_v32 = vmax.f32 %v1676_v24, 0.0  ;;  %v1681_v35 = vmax.f32 %v1677_v26, 0.0  ;;  %v1682_v36 = vmax.f32 %v1678_v27, 0.0 }
 0x616   :  { %1683 = vst [vmem:[#allocation13] sm:$0xff] %v1679_v31 }
 0x617   :  { %1684 = vst [vmem:[#allocation13 + $0x8] sm:$0xff] %v1680_v32 }
 0x618   :  { %1685 = vst [vmem:[#allocation13 + $0x10] sm:$0xff] %v1681_v35 }
 0x619   :  { %1686 = vst [vmem:[#allocation13 + $0x18] sm:$0xff] %v1682_v36 }
 0x61a   :  { %1699 = dma.vmem_to_hbm [thread:$0]  %s1692_s12, 512, %s1694_s14, [#allocation6], %s2227_s22, %s2227_s22, %s2228_s23  }
 0x61b   :  { %2224 = dma.done.wait [#allocation6], 512  }
 0x61c   :  { %2225 = vsyncadd [#allocation6], 4294966784 }
 0x61d   :  { %1704 = vsyncpa [#allocation5], 1 }
 0x61e   :  { %1705 = vsyncpa [#allocation8], 1 }
 0x61f   :  { %1706 = vsyncpa [#allocation11], 1 }
 0x620   :  { %1707 = vsyncpa [#allocation6], 1 }

</bundles_post_ra>
